<compile_context>
chip_gen: v7x
topology: tpu7x:2x2x1
jax: 0.10.0
libtpu: 0.0.40
codegen_flags: <defaults>
</compile_context>

<pallas_src>
import functools

import jax
import jax.numpy as jnp
from jax.experimental import pallas as pl
from jax.experimental.pallas import tpu as pltpu

BN_EPS = 1e-5
_MiB = 1024 * 1024


# ----------------------------- hardware / tiling -----------------------------


def _vmem_config():
    """(vmem_limit_bytes, per-step tile budget) for the current TPU generation."""
    cap = None
    try:
        cap = getattr(pltpu.get_tpu_info(), "vmem_capacity_bytes", None)
    except Exception:
        cap = None
    if not cap or cap <= 0:
        cap = 64 * _MiB                       # conservative default (v7x-sized)
    if cap >= 100 * _MiB:                     # v5e / v6e: 128 MiB physical VMEM
        limit = 96 * _MiB
    else:                                     # v7x: 64 MiB per TensorCore
        limit = 48 * _MiB
    return limit, (limit * 3) // 4            # leave headroom for compiler scratch


def _pick_tile_n(n_pad, cin, cout, x_bytes, y_bytes, w_bytes, budget, max_tile_n):
    """Largest lane-aligned point tile whose double-buffered VMEM cost fits."""
    cands = sorted({t for t in (2048, 1024, 512, 256, 128, n_pad)
                    if 0 < t <= n_pad and n_pad % t == 0 and t % 128 == 0},
                   reverse=True)
    if max_tile_n is not None:
        cands = [t for t in cands if t <= max_tile_n] or [128]
    for t in cands:
        cost = 2 * t * (cin * x_bytes + cout * y_bytes) + 2 * w_bytes
        if cost <= budget:
            return t
    return cands[-1]


def _full_spec(shape):
    zeros = (0,) * len(shape)
    return pl.BlockSpec(shape, lambda *_: zeros)


# ----------------------------- kernels --------------------------------------


def _layer_body(x_ref, scale_ref, shift_ref, w_ref, y_ref, sum_ref, sumsq_ref,
                *, apply_bn_relu, n_inner, tile_n, n_valid, need_mask):
    """One conv1d(k=1) layer:
         optional fused BN-apply (scale*h+shift) + ReLU prologue (f32 VPU math),
         bf16 MXU matmul with f32 accumulation,
         bf16 activation store,
         per-channel sum / sum-of-squares accumulation for this layer's BN."""
    ni = pl.program_id(2)

    # Init the stats accumulators at the first inner point-tile of this group.
    @pl.when(ni == 0)
    def _():
        sum_ref[0] = jnp.zeros(sum_ref.shape[1:], sum_ref.dtype)
        sumsq_ref[0] = jnp.zeros(sumsq_ref.shape[1:], sumsq_ref.dtype)

    # Elementwise math stays f32 (v5e has no bf16 VPU).
    h = x_ref[0].astype(jnp.float32)                          # (Cin, TILE_N)
    if apply_bn_relu:
        h = jnp.maximum(scale_ref[...] * h + shift_ref[...], 0.0)

    # MXU: bf16 operands, f32 accumulation.  No conv bias for layers 1-3:
    # training-mode BN subtracts the batch mean, so it cancels exactly.
    y = jnp.dot(w_ref[...], h.astype(jnp.bfloat16),
                preferred_element_type=jnp.float32)           # (Cout, TILE_N)

    # Store the activation in bf16 (halves HBM traffic of the next pass).
    y_ref[0] = y.astype(y_ref.dtype)

    # Global BN statistics from the f32 value (before the downcast), masking
    # any lanes beyond the real point count (padded region).
    if need_mask:
        start = (pl.program_id(1) * n_inner + ni) * tile_n
        lane = jax.lax.broadcasted_iota(jnp.int32, (1, tile_n), 1)
        y = jnp.where(start + lane < n_valid, y, 0.0)
    sum_ref[0] += jnp.sum(y, axis=-1, keepdims=True)          # (Cout, 1)
    sumsq_ref[0] += jnp.sum(y * y, axis=-1, keepdims=True)    # (Cout, 1)


def _final_layer_kernel(x_ref, scale_ref, shift_ref, w_ref, b_ref, o_ref):
    """Layer-3 BN apply + ReLU fused with conv4 (+bias) + tanh; lane-dense out."""
    h = jnp.maximum(scale_ref[...] * x_ref[0].astype(jnp.float32)
                    + shift_ref[...], 0.0)
    y = jnp.dot(w_ref[...], h.astype(jnp.bfloat16),
                preferred_element_type=jnp.float32) + b_ref[...]   # (2, TILE_N)
    o_ref[0] = jnp.tanh(y)


# --------------------------- pallas_call wrappers ----------------------------


def _layer_call(x, scale, shift, w, *, tile_n, n_outer, n_valid, vmem_limit):
    """One conv + BN-stats pass.  Returns (bf16 pre-BN activations, sum, sumsq)."""
    B, cin, n_pad = x.shape
    cout = w.shape[0]
    nt = n_pad // tile_n
    n_inner = nt // n_outer
    need_mask = (n_valid != n_pad)
    w_bf16 = w.astype(jnp.bfloat16)

    x_spec = pl.BlockSpec((1, cin, tile_n),
                          lambda bi, no, ni: (bi, 0, no * n_inner + ni))
    y_spec = pl.BlockSpec((1, cout, tile_n),
                          lambda bi, no, ni: (bi, 0, no * n_inner + ni))
    stat_spec = pl.BlockSpec((1, cout, 1),
                             lambda bi, no, ni: (bi * n_outer + no, 0, 0))

    body = functools.partial(_layer_body, apply_bn_relu=scale is not None,
                             n_inner=n_inner, tile_n=tile_n,
                             n_valid=n_valid, need_mask=need_mask)

    if scale is None:
        def kernel(x_r, w_r, y_r, s_r, q_r):
            body(x_r, None, None, w_r, y_r, s_r, q_r)
        operands = (x, w_bf16)
        in_specs = [x_spec, _full_spec((cout, cin))]
    else:
        def kernel(x_r, sc_r, sh_r, w_r, y_r, s_r, q_r):
            body(x_r, sc_r, sh_r, w_r, y_r, s_r, q_r)
        operands = (x, scale, shift, w_bf16)
        in_specs = [x_spec, _full_spec((cin, 1)), _full_spec((cin, 1)),
                    _full_spec((cout, cin))]

    cost = pl.CostEstimate(
        flops=2 * B * n_pad * cin * cout,
        transcendentals=0,
        bytes_accessed=(x.size * x.dtype.itemsize + 2 * B * cout * n_pad
                        + 2 * w.size + 8 * B * n_outer * cout))

    y, s_sum, s_sq = pl.pallas_call(
        kernel,
        out_shape=(jax.ShapeDtypeStruct((B, cout, n_pad), jnp.bfloat16),
                   jax.ShapeDtypeStruct((B * n_outer, cout, 1), jnp.float32),
                   jax.ShapeDtypeStruct((B * n_outer, cout, 1), jnp.float32)),
        grid=(B, n_outer, n_inner),
        in_specs=in_specs,
        out_specs=(y_spec, stat_spec, stat_spec),
        compiler_params=pltpu.CompilerParams(
            # (batch, outer point groups) are independent (megacore-parallel on
            # v7x); the inner point-tile axis carries the BN-stat accumulation.
            dimension_semantics=("parallel", "parallel", "arbitrary"),
            vmem_limit_bytes=vmem_limit),
        cost_estimate=cost,
    )(*operands)
    return y, s_sum, s_sq


def _finalize_bn(s_sum, s_sq, gamma, beta, m_total):
    """Partial (G, C, 1) stats -> fused per-channel scale/shift.  Tiny; plain JAX."""
    mean = jnp.sum(s_sum, axis=0) / m_total                        # (C, 1)
    var = jnp.maximum(jnp.sum(s_sq, axis=0) / m_total - mean * mean, 0.0)
    scale = gamma * jax.lax.rsqrt(var + BN_EPS)                    # (C, 1)
    shift = beta - mean * scale
    return scale, shift


def _final_call(x, scale, shift, w, b, *, tile_n, vmem_limit):
    B, cin, n_pad = x.shape
    nt = n_pad // tile_n
    cost = pl.CostEstimate(
        flops=2 * B * n_pad * cin * 2,
        transcendentals=2 * B * n_pad,
        bytes_accessed=x.size * x.dtype.itemsize + 4 * B * 2 * n_pad + 2 * w.size)
    return pl.pallas_call(
        _final_layer_kernel,
        out_shape=jax.ShapeDtypeStruct((B, 2, n_pad), jnp.float32),
        grid=(B, nt),
        in_specs=[pl.BlockSpec((1, cin, tile_n), lambda bi, ti: (bi, 0, ti)),
                  _full_spec((cin, 1)), _full_spec((cin, 1)),
                  _full_spec((2, cin)), _full_spec((2, 1))],
        out_specs=pl.BlockSpec((1, 2, tile_n), lambda bi, ti: (bi, 0, ti)),
        compiler_params=pltpu.CompilerParams(
            dimension_semantics=("parallel", "parallel"),
            vmem_limit_bytes=vmem_limit),
        cost_estimate=cost,
    )(x, scale, shift, w.astype(jnp.bfloat16), b)


@functools.partial(jax.jit, static_argnames=("max_tile_n",))
def refiner_forward(x_ncl, params, *, max_tile_n=None):
    """x_ncl: (B, C, N) float32 in PyTorch NCL layout -> (B, 2, N) float32."""
    B, c0, N = x_ncl.shape
    vmem_limit, budget = _vmem_config()

    # Pad the point axis up to a lane multiple; BN stats mask the padded lanes.
    n_pad = ((N + 127) // 128) * 128
    if n_pad != N:
        x_ncl = jnp.pad(x_ncl, ((0, 0), (0, 0), (0, n_pad - N)))
    m_total = B * N

    def plan(cin, cout, x_bytes, y_bytes):
        t = _pick_tile_n(n_pad, cin, cout, x_bytes, y_bytes,
                         2 * cin * cout, budget, max_tile_n)
        nt = n_pad // t
        # Split the point-tile axis for megacore when the batch axis can't.
        no = 2 if (B % 2 == 1 and nt % 2 == 0) else 1
        return t, no

    c1, c2, c3 = c0, c0 // 2, c0 // 4

    t1, no1 = plan(c0, c1, 4, 2)
    y1, s1, q1 = _layer_call(x_ncl, None, None, params["w1"],
                             tile_n=t1, n_outer=no1, n_valid=N,
                             vmem_limit=vmem_limit)
    sc1, sh1 = _finalize_bn(s1, q1, params["g1"], params["be1"], m_total)

    t2, no2 = plan(c1, c2, 2, 2)
    y2, s2, q2 = _layer_call(y1, sc1, sh1, params["w2"],
                             tile_n=t2, n_outer=no2, n_valid=N,
                             vmem_limit=vmem_limit)
    sc2, sh2 = _finalize_bn(s2, q2, params["g2"], params["be2"], m_total)

    t3, no3 = plan(c2, c3, 2, 2)
    y3, s3, q3 = _layer_call(y2, sc2, sh2, params["w3"],
                             tile_n=t3, n_outer=no3, n_valid=N,
                             vmem_limit=vmem_limit)
    sc3, sh3 = _finalize_bn(s3, q3, params["g3"], params["be3"], m_total)

    t4, _ = plan(c3, 2, 2, 4)
    out = _final_call(y3, sc3, sh3, params["w4"], params["b4"],
                      tile_n=t4, vmem_limit=vmem_limit)
    return out[:, :, :N] if n_pad != N else out


# ------------------------------ params & refs --------------------------------


def init_params(key, bottleneck_size):
    """Deterministic synthetic parameters matching the PyTorch module shapes.
    Conv1d(cin, cout, 1) weight (cout, cin, 1) is stored squeezed as (cout, cin);
    bias / BN affine params are stored as (cout, 1)."""
    c0 = bottleneck_size
    dims = [(c0, c0), (c0, c0 // 2), (c0 // 2, c0 // 4), (c0 // 4, 2)]
    params = {}
    keys = jax.random.split(key, 2 * len(dims))
    for i, (cin, cout) in enumerate(dims):
        kw, kb = keys[2 * i], keys[2 * i + 1]
        bound = 1.0 / (cin ** 0.5)  # PyTorch default uniform(-1/sqrt(fan_in), ...)
        params[f"w{i + 1}"] = jax.random.uniform(kw, (cout, cin), jnp.float32,
                                                 -bound, bound)
        params[f"b{i + 1}"] = jax.random.uniform(kb, (cout, 1), jnp.float32,
                                                 -bound, bound)
    for i, c in enumerate([c0, c0 // 2, c0 // 4]):
        params[f"g{i + 1}"] = jnp.ones((c, 1), jnp.float32)     # BN gamma
        params[f"be{i + 1}"] = jnp.zeros((c, 1), jnp.float32)   # BN beta
    return params


def refiner_reference_f32(x_ncl, params):
    """Pure-f32 reference mirroring the PyTorch forward (training-mode BN)."""
    h = x_ncl
    for i in (1, 2, 3):
        y = jnp.einsum("oc,bcn->bon", params[f"w{i}"], h,
                       precision=jax.lax.Precision.HIGHEST) + params[f"b{i}"][None]
        mean = jnp.mean(y, axis=(0, 2), keepdims=True)
        var = jnp.mean((y - mean) ** 2, axis=(0, 2), keepdims=True)
        yhat = (y - mean) * jax.lax.rsqrt(var + BN_EPS)
        h = jnp.maximum(params[f"g{i}"][None] * yhat + params[f"be{i}"][None], 0.0)
    y = jnp.einsum("oc,bcn->bon", params["w4"], h,
                   precision=jax.lax.Precision.HIGHEST) + params["b4"][None]
    return jnp.tanh(y)


def refiner_reference_matched(x_ncl, params):
    """Reference mirroring the kernel's numerics: bf16 MXU operands, f32 stats
    from the pre-downcast matmul result, bf16-stored activations, one-pass
    variance, fused scale/shift BN, no conv bias on layers 1-3 (BN cancels it)."""
    B, _, N = x_ncl.shape
    m_total = B * N
    h = x_ncl
    for i in (1, 2, 3, 4):
        w = params[f"w{i}"].astype(jnp.bfloat16).astype(jnp.float32)
        hb = h.astype(jnp.bfloat16).astype(jnp.float32)
        y = jnp.einsum("oc,bcn->bon", w, hb, precision=jax.lax.Precision.HIGHEST)
        if i == 4:
            return jnp.tanh(y + params["b4"][None])
        s = jnp.sum(y, axis=(0, 2), keepdims=True)
        ss = jnp.sum(y * y, axis=(0, 2), keepdims=True)
        mean = s / m_total
        var = jnp.maximum(ss / m_total - mean * mean, 0.0)
        scale = params[f"g{i}"][None] * jax.lax.rsqrt(var + BN_EPS)
        shift = params[f"be{i}"][None] - mean * scale
        y_stored = y.astype(jnp.bfloat16).astype(jnp.float32)   # bf16 round trip
        h = jnp.maximum(scale * y_stored + shift, 0.0)


# --------------------------------- main ---------------------------------------


def _run_case(bottleneck_size, B, N, key, max_tile_n=None):
    kx, kp = jax.random.split(key)
    x = jax.random.normal(kx, (B, bottleneck_size, N), jnp.float32)
    params = init_params(kp, bottleneck_size)

    out = jax.block_until_ready(refiner_forward(x, params, max_tile_n=max_tile_n))
    assert out.shape == (B, 2, N), out.shape

    # Tight check against a reference with matched (bf16 / f32-acc) numerics.
    err_m = float(jnp.max(jnp.abs(out - refiner_reference_matched(x, params))))
    assert err_m < 3e-3, f"matched-reference mismatch: {err_m}"

    # Loose sanity check against the pure-f32 PyTorch-semantics reference
    # (gap is the expected bf16 matmul / bf16 activation-storage precision).
    err_f = float(jnp.max(jnp.abs(out - refiner_reference_f32(x, params))))
    assert err_f < 0.3, f"f32-reference sanity gap too large: {err_f}"
    return err_m, err_f


if __name__ == "__main__":
    key = jax.random.PRNGKey(0)
    k1, k2, k3 = jax.random.split(key, 3)
    # Non-lane-aligned N: exercises the pad-to-128 + masked-BN-stats path.
    _run_case(bottleneck_size=32, B=2, N=16, key=k1)
    # Lane-aligned N: per-layer fat tiles, single point tile per batch element.
    _run_case(bottleneck_size=64, B=2, N=1024, key=k2)
    # B=1: exercises the (n_outer="parallel", n_inner="arbitrary") point split
    # and multi-tile BN-stat accumulation (max_tile_n caps tiles for coverage).
    _run_case(bottleneck_size=32, B=1, N=512, key=k3, max_tile_n=128)
    print("KERNEL_OK")
</pallas_src>

<mosaic_0001>
module attributes {stable_mosaic.version = 11 : i64} {
  func.func @kernel(%arg0: i32, %arg1: i32, %arg2: i32, %arg3: memref<1x32x128xf32, #tpu.memory_space<vmem>>, %arg4: memref<32x32xbf16, #tpu.memory_space<vmem>>, %arg5: memref<1x32x128xbf16, #tpu.memory_space<vmem>>, %arg6: memref<1x32x1xf32, #tpu.memory_space<vmem>>, %arg7: memref<1x32x1xf32, #tpu.memory_space<vmem>>) attributes {dimension_semantics = [#tpu.dimension_semantics<parallel>, #tpu.dimension_semantics<parallel>, #tpu.dimension_semantics<arbitrary>], iteration_bounds = array<i64: 2, 1, 1>, scalar_prefetch = 0 : i64, scratch_operands = 0 : i64, tpu.core_type = #tpu.core_type<tc>, window_params = [{transform_indices = @transform_0, window_bounds = array<i64: 1, 32, 128>}, {pipeline_mode = #tpu.pipeline_mode<synchronous>, transform_indices = @transform_1, window_bounds = array<i64: 32, 32>}, {transform_indices = @transform_2, window_bounds = array<i64: 1, 32, 128>}, {transform_indices = @transform_3, window_bounds = array<i64: 1, 32, 1>}, {transform_indices = @transform_4, window_bounds = array<i64: 1, 32, 1>}]} {
    %c0_i32 = arith.constant 0 : i32
    %0 = arith.cmpi eq, %arg2, %c0_i32 : i32
    %1 = arith.extui %0 : i1 to i32
    %c0_i32_0 = arith.constant 0 : i32
    %2 = arith.cmpi ne, %1, %c0_i32_0 : i32
    scf.if %2 {
      %cst_23 = arith.constant 0.000000e+00 : f32
      %41 = vector.broadcast %cst_23 : f32 to vector<32x1xf32>
      %c0_24 = arith.constant 0 : index
      %c0_25 = arith.constant 0 : index
      %c0_26 = arith.constant 0 : index
      %42 = vector.load %arg6[%c0_24, %c0_25, %c0_26] : memref<1x32x1xf32, #tpu.memory_space<vmem>>, vector<1x32x1xf32>
      %43 = vector.shape_cast %42 : vector<1x32x1xf32> to vector<32x1xf32>
      %44 = vector.shape_cast %41 : vector<32x1xf32> to vector<1x32x1xf32>
      tpu.vector_store %arg6[%c0_24, %c0_25, %c0_26], %44 {strides = array<i32>} : memref<1x32x1xf32, #tpu.memory_space<vmem>>, vector<1x32x1xf32>,
      %cst_27 = arith.constant 0.000000e+00 : f32
      %45 = vector.broadcast %cst_27 : f32 to vector<32x1xf32>
      %c0_28 = arith.constant 0 : index
      %c0_29 = arith.constant 0 : index
      %c0_30 = arith.constant 0 : index
      %46 = vector.load %arg7[%c0_28, %c0_29, %c0_30] : memref<1x32x1xf32, #tpu.memory_space<vmem>>, vector<1x32x1xf32>
      %47 = vector.shape_cast %46 : vector<1x32x1xf32> to vector<32x1xf32>
      %48 = vector.shape_cast %45 : vector<32x1xf32> to vector<1x32x1xf32>
      tpu.vector_store %arg7[%c0_28, %c0_29, %c0_30], %48 {strides = array<i32>} : memref<1x32x1xf32, #tpu.memory_space<vmem>>, vector<1x32x1xf32>,
    } else {
    }
    %c0 = arith.constant 0 : index
    %c0_1 = arith.constant 0 : index
    %c0_2 = arith.constant 0 : index
    %3 = vector.load %arg3[%c0, %c0_1, %c0_2] : memref<1x32x128xf32, #tpu.memory_space<vmem>>, vector<1x32x128xf32>
    %4 = vector.shape_cast %3 : vector<1x32x128xf32> to vector<32x128xf32>
    %c0_3 = arith.constant 0 : index
    %c0_4 = arith.constant 0 : index
    %5 = vector.load %arg4[%c0_3, %c0_4] : memref<32x32xbf16, #tpu.memory_space<vmem>>, vector<32x32xbf16>
    %6 = arith.truncf %4 : vector<32x128xf32> to vector<32x128xbf16>
    %cst = arith.constant dense<0.000000e+00> : vector<32x128xf32>
    %7 = tpu.matmul %5, %6, %cst {dimension_numbers = #tpu.dot_dimension_numbers<[1], [0], [0], [1], [0, 0, 1, 1], [], []>} : vector<32x32xbf16>, vector<32x128xbf16>, vector<32x128xf32> -> vector<32x128xf32>
    %8 = arith.truncf %7 : vector<32x128xf32> to vector<32x128xbf16>
    %c0_5 = arith.constant 0 : index
    %c0_6 = arith.constant 0 : index
    %c0_7 = arith.constant 0 : index
    %9 = vector.load %arg5[%c0_5, %c0_6, %c0_7] : memref<1x32x128xbf16, #tpu.memory_space<vmem>>, vector<1x32x128xbf16>
    %10 = vector.shape_cast %9 : vector<1x32x128xbf16> to vector<32x128xbf16>
    %11 = vector.shape_cast %8 : vector<32x128xbf16> to vector<1x32x128xbf16>
    tpu.vector_store %arg5[%c0_5, %c0_6, %c0_7], %11 {strides = array<i32>} : memref<1x32x128xbf16, #tpu.memory_space<vmem>>, vector<1x32x128xbf16>,
    %c1_i32 = arith.constant 1 : i32
    %12 = arith.muli %arg1, %c1_i32 : i32
    %13 = arith.addi %12, %arg2 : i32
    %c128_i32 = arith.constant 128 : i32
    %14 = arith.muli %13, %c128_i32 : i32
    %15 = tpu.iota {dimensions = array<i32: 1>} : vector<1x128xi32>
    %16 = vector.broadcast %14 : i32 to vector<1x128xi32>
    %17 = arith.addi %16, %15 : vector<1x128xi32>
    %c16_i32 = arith.constant 16 : i32
    %18 = vector.broadcast %c16_i32 : i32 to vector<1x128xi32>
    %19 = arith.cmpi slt, %17, %18 : vector<1x128xi32>
    %cst_8 = arith.constant 0.000000e+00 : f32
    %20 = vector.shape_cast %19 : vector<1x128xi1> to vector<1x128xi1>
    %21 = vector.broadcast %20 : vector<1x128xi1> to vector<32x128xi1>
    %22 = vector.broadcast %cst_8 : f32 to vector<32x128xf32>
    %23 = arith.select %21, %7, %22 : vector<32x128xi1>, vector<32x128xf32>
    %c0_9 = arith.constant 0 : index
    %c0_10 = arith.constant 0 : index
    %c0_11 = arith.constant 0 : index
    %24 = vector.load %arg6[%c0_9, %c0_10, %c0_11] : memref<1x32x1xf32, #tpu.memory_space<vmem>>, vector<1x32x1xf32>
    %25 = vector.shape_cast %24 : vector<1x32x1xf32> to vector<32x1xf32>
    %cst_12 = arith.constant dense<0.000000e+00> : vector<32xf32>
    %26 = vector.multi_reduction <add>, %23, %cst_12 [1] : vector<32x128xf32> to vector<32xf32>
    %27 = vector.shape_cast %26 : vector<32xf32> to vector<32x1xf32>
    %28 = arith.addf %25, %27 : vector<32x1xf32>
    %c0_13 = arith.constant 0 : index
    %c0_14 = arith.constant 0 : index
    %c0_15 = arith.constant 0 : index
    %29 = vector.load %arg6[%c0_13, %c0_14, %c0_15] : memref<1x32x1xf32, #tpu.memory_space<vmem>>, vector<1x32x1xf32>
    %30 = vector.shape_cast %29 : vector<1x32x1xf32> to vector<32x1xf32>
    %31 = vector.shape_cast %28 : vector<32x1xf32> to vector<1x32x1xf32>
    tpu.vector_store %arg6[%c0_13, %c0_14, %c0_15], %31 {strides = array<i32>} : memref<1x32x1xf32, #tpu.memory_space<vmem>>, vector<1x32x1xf32>,
    %c0_16 = arith.constant 0 : index
    %c0_17 = arith.constant 0 : index
    %c0_18 = arith.constant 0 : index
    %32 = vector.load %arg7[%c0_16, %c0_17, %c0_18] : memref<1x32x1xf32, #tpu.memory_space<vmem>>, vector<1x32x1xf32>
    %33 = vector.shape_cast %32 : vector<1x32x1xf32> to vector<32x1xf32>
    %34 = arith.mulf %23, %23 : vector<32x128xf32>
    %cst_19 = arith.constant dense<0.000000e+00> : vector<32xf32>
    %35 = vector.multi_reduction <add>, %34, %cst_19 [1] : vector<32x128xf32> to vector<32xf32>
    %36 = vector.shape_cast %35 : vector<32xf32> to vector<32x1xf32>
    %37 = arith.addf %33, %36 : vector<32x1xf32>
    %c0_20 = arith.constant 0 : index
    %c0_21 = arith.constant 0 : index
    %c0_22 = arith.constant 0 : index
    %38 = vector.load %arg7[%c0_20, %c0_21, %c0_22] : memref<1x32x1xf32, #tpu.memory_space<vmem>>, vector<1x32x1xf32>
    %39 = vector.shape_cast %38 : vector<1x32x1xf32> to vector<32x1xf32>
    %40 = vector.shape_cast %37 : vector<32x1xf32> to vector<1x32x1xf32>
    tpu.vector_store %arg7[%c0_20, %c0_21, %c0_22], %40 {strides = array<i32>} : memref<1x32x1xf32, #tpu.memory_space<vmem>>, vector<1x32x1xf32>,
    return
  }
  func.func @transform_0(%arg0: i32, %arg1: i32, %arg2: i32) -> (i32, i32, i32) {
    %c1_i32 = arith.constant 1 : i32
    %0 = arith.muli %arg1, %c1_i32 : i32
    %1 = arith.addi %0, %arg2 : i32
    %c0_i32 = arith.constant 0 : i32
    %c0_i32_0 = arith.constant 0 : i32
    return %arg0, %c0_i32, %1 : i32, i32, i32
  }
  func.func @transform_1(%arg0: i32, %arg1: i32, %arg2: i32) -> (i32, i32) {
    %c0_i32 = arith.constant 0 : i32
    %c0_i32_0 = arith.constant 0 : i32
    %c0_i32_1 = arith.constant 0 : i32
    return %c0_i32, %c0_i32_0 : i32, i32
  }
  func.func @transform_2(%arg0: i32, %arg1: i32, %arg2: i32) -> (i32, i32, i32) {
    %c1_i32 = arith.constant 1 : i32
    %0 = arith.muli %arg1, %c1_i32 : i32
    %1 = arith.addi %0, %arg2 : i32
    %c0_i32 = arith.constant 0 : i32
    %c0_i32_0 = arith.constant 0 : i32
    return %arg0, %c0_i32, %1 : i32, i32, i32
  }
  func.func @transform_3(%arg0: i32, %arg1: i32, %arg2: i32) -> (i32, i32, i32) {
    %c1_i32 = arith.constant 1 : i32
    %0 = arith.muli %arg0, %c1_i32 : i32
    %1 = arith.addi %0, %arg1 : i32
    %c0_i32 = arith.constant 0 : i32
    %c0_i32_0 = arith.constant 0 : i32
    %c0_i32_1 = arith.constant 0 : i32
    return %1, %c0_i32, %c0_i32_0 : i32, i32, i32
  }
  func.func @transform_4(%arg0: i32, %arg1: i32, %arg2: i32) -> (i32, i32, i32) {
    %c1_i32 = arith.constant 1 : i32
    %0 = arith.muli %arg0, %c1_i32 : i32
    %1 = arith.addi %0, %arg1 : i32
    %c0_i32 = arith.constant 0 : i32
    %c0_i32_0 = arith.constant 0 : i32
    %c0_i32_1 = arith.constant 0 : i32
    return %1, %c0_i32, %c0_i32_0 : i32, i32, i32
  }
}

module attributes {stable_mosaic.version = 11 : i64} {
  func.func @kernel(%arg0: i32, %arg1: i32, %arg2: i32, %arg3: memref<1x32x128xbf16, #tpu.memory_space<vmem>>, %arg4: memref<32x1xf32, #tpu.memory_space<vmem>>, %arg5: memref<32x1xf32, #tpu.memory_space<vmem>>, %arg6: memref<16x32xbf16, #tpu.memory_space<vmem>>, %arg7: memref<1x16x128xbf16, #tpu.memory_space<vmem>>, %arg8: memref<1x16x1xf32, #tpu.memory_space<vmem>>, %arg9: memref<1x16x1xf32, #tpu.memory_space<vmem>>) attributes {dimension_semantics = [#tpu.dimension_semantics<parallel>, #tpu.dimension_semantics<parallel>, #tpu.dimension_semantics<arbitrary>], iteration_bounds = array<i64: 2, 1, 1>, scalar_prefetch = 0 : i64, scratch_operands = 0 : i64, tpu.core_type = #tpu.core_type<tc>, window_params = [{transform_indices = @transform_0, window_bounds = array<i64: 1, 32, 128>}, {pipeline_mode = #tpu.pipeline_mode<synchronous>, transform_indices = @transform_1, window_bounds = array<i64: 32, 1>}, {pipeline_mode = #tpu.pipeline_mode<synchronous>, transform_indices = @transform_2, window_bounds = array<i64: 32, 1>}, {pipeline_mode = #tpu.pipeline_mode<synchronous>, transform_indices = @transform_3, window_bounds = array<i64: 16, 32>}, {transform_indices = @transform_4, window_bounds = array<i64: 1, 16, 128>}, {transform_indices = @transform_5, window_bounds = array<i64: 1, 16, 1>}, {transform_indices = @transform_6, window_bounds = array<i64: 1, 16, 1>}]} {
    %c0_i32 = arith.constant 0 : i32
    %0 = arith.cmpi eq, %arg2, %c0_i32 : i32
    %1 = arith.extui %0 : i1 to i32
    %c0_i32_0 = arith.constant 0 : i32
    %2 = arith.cmpi ne, %1, %c0_i32_0 : i32
    scf.if %2 {
      %cst_28 = arith.constant 0.000000e+00 : f32
      %50 = vector.broadcast %cst_28 : f32 to vector<16x1xf32>
      %c0_29 = arith.constant 0 : index
      %c0_30 = arith.constant 0 : index
      %c0_31 = arith.constant 0 : index
      %51 = vector.load %arg8[%c0_29, %c0_30, %c0_31] : memref<1x16x1xf32, #tpu.memory_space<vmem>>, vector<1x16x1xf32>
      %52 = vector.shape_cast %51 : vector<1x16x1xf32> to vector<16x1xf32>
      %53 = vector.shape_cast %50 : vector<16x1xf32> to vector<1x16x1xf32>
      tpu.vector_store %arg8[%c0_29, %c0_30, %c0_31], %53 {strides = array<i32>} : memref<1x16x1xf32, #tpu.memory_space<vmem>>, vector<1x16x1xf32>,
      %cst_32 = arith.constant 0.000000e+00 : f32
      %54 = vector.broadcast %cst_32 : f32 to vector<16x1xf32>
      %c0_33 = arith.constant 0 : index
      %c0_34 = arith.constant 0 : index
      %c0_35 = arith.constant 0 : index
      %55 = vector.load %arg9[%c0_33, %c0_34, %c0_35] : memref<1x16x1xf32, #tpu.memory_space<vmem>>, vector<1x16x1xf32>
      %56 = vector.shape_cast %55 : vector<1x16x1xf32> to vector<16x1xf32>
      %57 = vector.shape_cast %54 : vector<16x1xf32> to vector<1x16x1xf32>
      tpu.vector_store %arg9[%c0_33, %c0_34, %c0_35], %57 {strides = array<i32>} : memref<1x16x1xf32, #tpu.memory_space<vmem>>, vector<1x16x1xf32>,
    } else {
    }
    %c0 = arith.constant 0 : index
    %c0_1 = arith.constant 0 : index
    %c0_2 = arith.constant 0 : index
    %3 = vector.load %arg3[%c0, %c0_1, %c0_2] : memref<1x32x128xbf16, #tpu.memory_space<vmem>>, vector<1x32x128xbf16>
    %4 = vector.shape_cast %3 : vector<1x32x128xbf16> to vector<32x128xbf16>
    %5 = arith.extf %4 : vector<32x128xbf16> to vector<32x128xf32>
    %c0_3 = arith.constant 0 : index
    %c0_4 = arith.constant 0 : index
    %6 = vector.load %arg4[%c0_3, %c0_4] : memref<32x1xf32, #tpu.memory_space<vmem>>, vector<32x1xf32>
    %7 = vector.broadcast %6 : vector<32x1xf32> to vector<32x128xf32>
    %8 = arith.mulf %7, %5 : vector<32x128xf32>
    %c0_5 = arith.constant 0 : index
    %c0_6 = arith.constant 0 : index
    %9 = vector.load %arg5[%c0_5, %c0_6] : memref<32x1xf32, #tpu.memory_space<vmem>>, vector<32x1xf32>
    %10 = vector.broadcast %9 : vector<32x1xf32> to vector<32x128xf32>
    %11 = arith.addf %8, %10 : vector<32x128xf32>
    %cst = arith.constant 0.000000e+00 : f32
    %12 = vector.broadcast %cst : f32 to vector<32x128xf32>
    %13 = arith.maximumf %11, %12 : vector<32x128xf32>
    %c0_7 = arith.constant 0 : index
    %c0_8 = arith.constant 0 : index
    %14 = vector.load %arg6[%c0_7, %c0_8] : memref<16x32xbf16, #tpu.memory_space<vmem>>, vector<16x32xbf16>
    %15 = arith.truncf %13 : vector<32x128xf32> to vector<32x128xbf16>
    %cst_9 = arith.constant dense<0.000000e+00> : vector<16x128xf32>
    %16 = tpu.matmul %14, %15, %cst_9 {dimension_numbers = #tpu.dot_dimension_numbers<[1], [0], [0], [1], [0, 0, 1, 1], [], []>} : vector<16x32xbf16>, vector<32x128xbf16>, vector<16x128xf32> -> vector<16x128xf32>
    %17 = arith.truncf %16 : vector<16x128xf32> to vector<16x128xbf16>
    %c0_10 = arith.constant 0 : index
    %c0_11 = arith.constant 0 : index
    %c0_12 = arith.constant 0 : index
    %18 = vector.load %arg7[%c0_10, %c0_11, %c0_12] : memref<1x16x128xbf16, #tpu.memory_space<vmem>>, vector<1x16x128xbf16>
    %19 = vector.shape_cast %18 : vector<1x16x128xbf16> to vector<16x128xbf16>
    %20 = vector.shape_cast %17 : vector<16x128xbf16> to vector<1x16x128xbf16>
    tpu.vector_store %arg7[%c0_10, %c0_11, %c0_12], %20 {strides = array<i32>} : memref<1x16x128xbf16, #tpu.memory_space<vmem>>, vector<1x16x128xbf16>,
    %c1_i32 = arith.constant 1 : i32
    %21 = arith.muli %arg1, %c1_i32 : i32
    %22 = arith.addi %21, %arg2 : i32
    %c128_i32 = arith.constant 128 : i32
    %23 = arith.muli %22, %c128_i32 : i32
    %24 = tpu.iota {dimensions = array<i32: 1>} : vector<1x128xi32>
    %25 = vector.broadcast %23 : i32 to vector<1x128xi32>
    %26 = arith.addi %25, %24 : vector<1x128xi32>
    %c16_i32 = arith.constant 16 : i32
    %27 = vector.broadcast %c16_i32 : i32 to vector<1x128xi32>
    %28 = arith.cmpi slt, %26, %27 : vector<1x128xi32>
    %cst_13 = arith.constant 0.000000e+00 : f32
    %29 = vector.shape_cast %28 : vector<1x128xi1> to vector<1x128xi1>
    %30 = vector.broadcast %29 : vector<1x128xi1> to vector<16x128xi1>
    %31 = vector.broadcast %cst_13 : f32 to vector<16x128xf32>
    %32 = arith.select %30, %16, %31 : vector<16x128xi1>, vector<16x128xf32>
    %c0_14 = arith.constant 0 : index
    %c0_15 = arith.constant 0 : index
    %c0_16 = arith.constant 0 : index
    %33 = vector.load %arg8[%c0_14, %c0_15, %c0_16] : memref<1x16x1xf32, #tpu.memory_space<vmem>>, vector<1x16x1xf32>
    %34 = vector.shape_cast %33 : vector<1x16x1xf32> to vector<16x1xf32>
    %cst_17 = arith.constant dense<0.000000e+00> : vector<16xf32>
    %35 = vector.multi_reduction <add>, %32, %cst_17 [1] : vector<16x128xf32> to vector<16xf32>
    %36 = vector.shape_cast %35 : vector<16xf32> to vector<16x1xf32>
    %37 = arith.addf %34, %36 : vector<16x1xf32>
    %c0_18 = arith.constant 0 : index
    %c0_19 = arith.constant 0 : index
    %c0_20 = arith.constant 0 : index
    %38 = vector.load %arg8[%c0_18, %c0_19, %c0_20] : memref<1x16x1xf32, #tpu.memory_space<vmem>>, vector<1x16x1xf32>
    %39 = vector.shape_cast %38 : vector<1x16x1xf32> to vector<16x1xf32>
    %40 = vector.shape_cast %37 : vector<16x1xf32> to vector<1x16x1xf32>
    tpu.vector_store %arg8[%c0_18, %c0_19, %c0_20], %40 {strides = array<i32>} : memref<1x16x1xf32, #tpu.memory_space<vmem>>, vector<1x16x1xf32>,
    %c0_21 = arith.constant 0 : index
    %c0_22 = arith.constant 0 : index
    %c0_23 = arith.constant 0 : index
    %41 = vector.load %arg9[%c0_21, %c0_22, %c0_23] : memref<1x16x1xf32, #tpu.memory_space<vmem>>, vector<1x16x1xf32>
    %42 = vector.shape_cast %41 : vector<1x16x1xf32> to vector<16x1xf32>
    %43 = arith.mulf %32, %32 : vector<16x128xf32>
    %cst_24 = arith.constant dense<0.000000e+00> : vector<16xf32>
    %44 = vector.multi_reduction <add>, %43, %cst_24 [1] : vector<16x128xf32> to vector<16xf32>
    %45 = vector.shape_cast %44 : vector<16xf32> to vector<16x1xf32>
    %46 = arith.addf %42, %45 : vector<16x1xf32>
    %c0_25 = arith.constant 0 : index
    %c0_26 = arith.constant 0 : index
    %c0_27 = arith.constant 0 : index
    %47 = vector.load %arg9[%c0_25, %c0_26, %c0_27] : memref<1x16x1xf32, #tpu.memory_space<vmem>>, vector<1x16x1xf32>
    %48 = vector.shape_cast %47 : vector<1x16x1xf32> to vector<16x1xf32>
    %49 = vector.shape_cast %46 : vector<16x1xf32> to vector<1x16x1xf32>
    tpu.vector_store %arg9[%c0_25, %c0_26, %c0_27], %49 {strides = array<i32>} : memref<1x16x1xf32, #tpu.memory_space<vmem>>, vector<1x16x1xf32>,
    return
  }
  func.func @transform_0(%arg0: i32, %arg1: i32, %arg2: i32) -> (i32, i32, i32) {
    %c1_i32 = arith.constant 1 : i32
    %0 = arith.muli %arg1, %c1_i32 : i32
    %1 = arith.addi %0, %arg2 : i32
    %c0_i32 = arith.constant 0 : i32
    %c0_i32_0 = arith.constant 0 : i32
    return %arg0, %c0_i32, %1 : i32, i32, i32
  }
  func.func @transform_1(%arg0: i32, %arg1: i32, %arg2: i32) -> (i32, i32) {
    %c0_i32 = arith.constant 0 : i32
    %c0_i32_0 = arith.constant 0 : i32
    %c0_i32_1 = arith.constant 0 : i32
    return %c0_i32, %c0_i32_0 : i32, i32
  }
  func.func @transform_2(%arg0: i32, %arg1: i32, %arg2: i32) -> (i32, i32) {
    %c0_i32 = arith.constant 0 : i32
    %c0_i32_0 = arith.constant 0 : i32
    %c0_i32_1 = arith.constant 0 : i32
    return %c0_i32, %c0_i32_0 : i32, i32
  }
  func.func @transform_3(%arg0: i32, %arg1: i32, %arg2: i32) -> (i32, i32) {
    %c0_i32 = arith.constant 0 : i32
    %c0_i32_0 = arith.constant 0 : i32
    %c0_i32_1 = arith.constant 0 : i32
    return %c0_i32, %c0_i32_0 : i32, i32
  }
  func.func @transform_4(%arg0: i32, %arg1: i32, %arg2: i32) -> (i32, i32, i32) {
    %c1_i32 = arith.constant 1 : i32
    %0 = arith.muli %arg1, %c1_i32 : i32
    %1 = arith.addi %0, %arg2 : i32
    %c0_i32 = arith.constant 0 : i32
    %c0_i32_0 = arith.constant 0 : i32
    return %arg0, %c0_i32, %1 : i32, i32, i32
  }
  func.func @transform_5(%arg0: i32, %arg1: i32, %arg2: i32) -> (i32, i32, i32) {
    %c1_i32 = arith.constant 1 : i32
    %0 = arith.muli %arg0, %c1_i32 : i32
    %1 = arith.addi %0, %arg1 : i32
    %c0_i32 = arith.constant 0 : i32
    %c0_i32_0 = arith.constant 0 : i32
    %c0_i32_1 = arith.constant 0 : i32
    return %1, %c0_i32, %c0_i32_0 : i32, i32, i32
  }
  func.func @transform_6(%arg0: i32, %arg1: i32, %arg2: i32) -> (i32, i32, i32) {
    %c1_i32 = arith.constant 1 : i32
    %0 = arith.muli %arg0, %c1_i32 : i32
    %1 = arith.addi %0, %arg1 : i32
    %c0_i32 = arith.constant 0 : i32
    %c0_i32_0 = arith.constant 0 : i32
    %c0_i32_1 = arith.constant 0 : i32
    return %1, %c0_i32, %c0_i32_0 : i32, i32, i32
  }
}

module attributes {stable_mosaic.version = 11 : i64} {
  func.func @kernel(%arg0: i32, %arg1: i32, %arg2: i32, %arg3: memref<1x16x128xbf16, #tpu.memory_space<vmem>>, %arg4: memref<16x1xf32, #tpu.memory_space<vmem>>, %arg5: memref<16x1xf32, #tpu.memory_space<vmem>>, %arg6: memref<8x16xbf16, #tpu.memory_space<vmem>>, %arg7: memref<1x8x128xbf16, #tpu.memory_space<vmem>>, %arg8: memref<1x8x1xf32, #tpu.memory_space<vmem>>, %arg9: memref<1x8x1xf32, #tpu.memory_space<vmem>>) attributes {dimension_semantics = [#tpu.dimension_semantics<parallel>, #tpu.dimension_semantics<parallel>, #tpu.dimension_semantics<arbitrary>], iteration_bounds = array<i64: 2, 1, 1>, scalar_prefetch = 0 : i64, scratch_operands = 0 : i64, tpu.core_type = #tpu.core_type<tc>, window_params = [{transform_indices = @transform_0, window_bounds = array<i64: 1, 16, 128>}, {pipeline_mode = #tpu.pipeline_mode<synchronous>, transform_indices = @transform_1, window_bounds = array<i64: 16, 1>}, {pipeline_mode = #tpu.pipeline_mode<synchronous>, transform_indices = @transform_2, window_bounds = array<i64: 16, 1>}, {pipeline_mode = #tpu.pipeline_mode<synchronous>, transform_indices = @transform_3, window_bounds = array<i64: 8, 16>}, {transform_indices = @transform_4, window_bounds = array<i64: 1, 8, 128>}, {transform_indices = @transform_5, window_bounds = array<i64: 1, 8, 1>}, {transform_indices = @transform_6, window_bounds = array<i64: 1, 8, 1>}]} {
    %c0_i32 = arith.constant 0 : i32
    %0 = arith.cmpi eq, %arg2, %c0_i32 : i32
    %1 = arith.extui %0 : i1 to i32
    %c0_i32_0 = arith.constant 0 : i32
    %2 = arith.cmpi ne, %1, %c0_i32_0 : i32
    scf.if %2 {
      %cst_28 = arith.constant 0.000000e+00 : f32
      %50 = vector.broadcast %cst_28 : f32 to vector<8x1xf32>
      %c0_29 = arith.constant 0 : index
      %c0_30 = arith.constant 0 : index
      %c0_31 = arith.constant 0 : index
      %51 = vector.load %arg8[%c0_29, %c0_30, %c0_31] : memref<1x8x1xf32, #tpu.memory_space<vmem>>, vector<1x8x1xf32>
      %52 = vector.shape_cast %51 : vector<1x8x1xf32> to vector<8x1xf32>
      %53 = vector.shape_cast %50 : vector<8x1xf32> to vector<1x8x1xf32>
      tpu.vector_store %arg8[%c0_29, %c0_30, %c0_31], %53 {strides = array<i32>} : memref<1x8x1xf32, #tpu.memory_space<vmem>>, vector<1x8x1xf32>,
      %cst_32 = arith.constant 0.000000e+00 : f32
      %54 = vector.broadcast %cst_32 : f32 to vector<8x1xf32>
      %c0_33 = arith.constant 0 : index
      %c0_34 = arith.constant 0 : index
      %c0_35 = arith.constant 0 : index
      %55 = vector.load %arg9[%c0_33, %c0_34, %c0_35] : memref<1x8x1xf32, #tpu.memory_space<vmem>>, vector<1x8x1xf32>
      %56 = vector.shape_cast %55 : vector<1x8x1xf32> to vector<8x1xf32>
      %57 = vector.shape_cast %54 : vector<8x1xf32> to vector<1x8x1xf32>
      tpu.vector_store %arg9[%c0_33, %c0_34, %c0_35], %57 {strides = array<i32>} : memref<1x8x1xf32, #tpu.memory_space<vmem>>, vector<1x8x1xf32>,
    } else {
    }
    %c0 = arith.constant 0 : index
    %c0_1 = arith.constant 0 : index
    %c0_2 = arith.constant 0 : index
    %3 = vector.load %arg3[%c0, %c0_1, %c0_2] : memref<1x16x128xbf16, #tpu.memory_space<vmem>>, vector<1x16x128xbf16>
    %4 = vector.shape_cast %3 : vector<1x16x128xbf16> to vector<16x128xbf16>
    %5 = arith.extf %4 : vector<16x128xbf16> to vector<16x128xf32>
    %c0_3 = arith.constant 0 : index
    %c0_4 = arith.constant 0 : index
    %6 = vector.load %arg4[%c0_3, %c0_4] : memref<16x1xf32, #tpu.memory_space<vmem>>, vector<16x1xf32>
    %7 = vector.broadcast %6 : vector<16x1xf32> to vector<16x128xf32>
    %8 = arith.mulf %7, %5 : vector<16x128xf32>
    %c0_5 = arith.constant 0 : index
    %c0_6 = arith.constant 0 : index
    %9 = vector.load %arg5[%c0_5, %c0_6] : memref<16x1xf32, #tpu.memory_space<vmem>>, vector<16x1xf32>
    %10 = vector.broadcast %9 : vector<16x1xf32> to vector<16x128xf32>
    %11 = arith.addf %8, %10 : vector<16x128xf32>
    %cst = arith.constant 0.000000e+00 : f32
    %12 = vector.broadcast %cst : f32 to vector<16x128xf32>
    %13 = arith.maximumf %11, %12 : vector<16x128xf32>
    %c0_7 = arith.constant 0 : index
    %c0_8 = arith.constant 0 : index
    %14 = vector.load %arg6[%c0_7, %c0_8] : memref<8x16xbf16, #tpu.memory_space<vmem>>, vector<8x16xbf16>
    %15 = arith.truncf %13 : vector<16x128xf32> to vector<16x128xbf16>
    %cst_9 = arith.constant dense<0.000000e+00> : vector<8x128xf32>
    %16 = tpu.matmul %14, %15, %cst_9 {dimension_numbers = #tpu.dot_dimension_numbers<[1], [0], [0], [1], [0, 0, 1, 1], [], []>} : vector<8x16xbf16>, vector<16x128xbf16>, vector<8x128xf32> -> vector<8x128xf32>
    %17 = arith.truncf %16 : vector<8x128xf32> to vector<8x128xbf16>
    %c0_10 = arith.constant 0 : index
    %c0_11 = arith.constant 0 : index
    %c0_12 = arith.constant 0 : index
    %18 = vector.load %arg7[%c0_10, %c0_11, %c0_12] : memref<1x8x128xbf16, #tpu.memory_space<vmem>>, vector<1x8x128xbf16>
    %19 = vector.shape_cast %18 : vector<1x8x128xbf16> to vector<8x128xbf16>
    %20 = vector.shape_cast %17 : vector<8x128xbf16> to vector<1x8x128xbf16>
    tpu.vector_store %arg7[%c0_10, %c0_11, %c0_12], %20 {strides = array<i32>} : memref<1x8x128xbf16, #tpu.memory_space<vmem>>, vector<1x8x128xbf16>,
    %c1_i32 = arith.constant 1 : i32
    %21 = arith.muli %arg1, %c1_i32 : i32
    %22 = arith.addi %21, %arg2 : i32
    %c128_i32 = arith.constant 128 : i32
    %23 = arith.muli %22, %c128_i32 : i32
    %24 = tpu.iota {dimensions = array<i32: 1>} : vector<1x128xi32>
    %25 = vector.broadcast %23 : i32 to vector<1x128xi32>
    %26 = arith.addi %25, %24 : vector<1x128xi32>
    %c16_i32 = arith.constant 16 : i32
    %27 = vector.broadcast %c16_i32 : i32 to vector<1x128xi32>
    %28 = arith.cmpi slt, %26, %27 : vector<1x128xi32>
    %cst_13 = arith.constant 0.000000e+00 : f32
    %29 = vector.shape_cast %28 : vector<1x128xi1> to vector<1x128xi1>
    %30 = vector.broadcast %29 : vector<1x128xi1> to vector<8x128xi1>
    %31 = vector.broadcast %cst_13 : f32 to vector<8x128xf32>
    %32 = arith.select %30, %16, %31 : vector<8x128xi1>, vector<8x128xf32>
    %c0_14 = arith.constant 0 : index
    %c0_15 = arith.constant 0 : index
    %c0_16 = arith.constant 0 : index
    %33 = vector.load %arg8[%c0_14, %c0_15, %c0_16] : memref<1x8x1xf32, #tpu.memory_space<vmem>>, vector<1x8x1xf32>
    %34 = vector.shape_cast %33 : vector<1x8x1xf32> to vector<8x1xf32>
    %cst_17 = arith.constant dense<0.000000e+00> : vector<8xf32>
    %35 = vector.multi_reduction <add>, %32, %cst_17 [1] : vector<8x128xf32> to vector<8xf32>
    %36 = vector.shape_cast %35 : vector<8xf32> to vector<8x1xf32>
    %37 = arith.addf %34, %36 : vector<8x1xf32>
    %c0_18 = arith.constant 0 : index
    %c0_19 = arith.constant 0 : index
    %c0_20 = arith.constant 0 : index
    %38 = vector.load %arg8[%c0_18, %c0_19, %c0_20] : memref<1x8x1xf32, #tpu.memory_space<vmem>>, vector<1x8x1xf32>
    %39 = vector.shape_cast %38 : vector<1x8x1xf32> to vector<8x1xf32>
    %40 = vector.shape_cast %37 : vector<8x1xf32> to vector<1x8x1xf32>
    tpu.vector_store %arg8[%c0_18, %c0_19, %c0_20], %40 {strides = array<i32>} : memref<1x8x1xf32, #tpu.memory_space<vmem>>, vector<1x8x1xf32>,
    %c0_21 = arith.constant 0 : index
    %c0_22 = arith.constant 0 : index
    %c0_23 = arith.constant 0 : index
    %41 = vector.load %arg9[%c0_21, %c0_22, %c0_23] : memref<1x8x1xf32, #tpu.memory_space<vmem>>, vector<1x8x1xf32>
    %42 = vector.shape_cast %41 : vector<1x8x1xf32> to vector<8x1xf32>
    %43 = arith.mulf %32, %32 : vector<8x128xf32>
    %cst_24 = arith.constant dense<0.000000e+00> : vector<8xf32>
    %44 = vector.multi_reduction <add>, %43, %cst_24 [1] : vector<8x128xf32> to vector<8xf32>
    %45 = vector.shape_cast %44 : vector<8xf32> to vector<8x1xf32>
    %46 = arith.addf %42, %45 : vector<8x1xf32>
    %c0_25 = arith.constant 0 : index
    %c0_26 = arith.constant 0 : index
    %c0_27 = arith.constant 0 : index
    %47 = vector.load %arg9[%c0_25, %c0_26, %c0_27] : memref<1x8x1xf32, #tpu.memory_space<vmem>>, vector<1x8x1xf32>
    %48 = vector.shape_cast %47 : vector<1x8x1xf32> to vector<8x1xf32>
    %49 = vector.shape_cast %46 : vector<8x1xf32> to vector<1x8x1xf32>
    tpu.vector_store %arg9[%c0_25, %c0_26, %c0_27], %49 {strides = array<i32>} : memref<1x8x1xf32, #tpu.memory_space<vmem>>, vector<1x8x1xf32>,
    return
  }
  func.func @transform_0(%arg0: i32, %arg1: i32, %arg2: i32) -> (i32, i32, i32) {
    %c1_i32 = arith.constant 1 : i32
    %0 = arith.muli %arg1, %c1_i32 : i32
    %1 = arith.addi %0, %arg2 : i32
    %c0_i32 = arith.constant 0 : i32
    %c0_i32_0 = arith.constant 0 : i32
    return %arg0, %c0_i32, %1 : i32, i32, i32
  }
  func.func @transform_1(%arg0: i32, %arg1: i32, %arg2: i32) -> (i32, i32) {
    %c0_i32 = arith.constant 0 : i32
    %c0_i32_0 = arith.constant 0 : i32
    %c0_i32_1 = arith.constant 0 : i32
    return %c0_i32, %c0_i32_0 : i32, i32
  }
  func.func @transform_2(%arg0: i32, %arg1: i32, %arg2: i32) -> (i32, i32) {
    %c0_i32 = arith.constant 0 : i32
    %c0_i32_0 = arith.constant 0 : i32
    %c0_i32_1 = arith.constant 0 : i32
    return %c0_i32, %c0_i32_0 : i32, i32
  }
  func.func @transform_3(%arg0: i32, %arg1: i32, %arg2: i32) -> (i32, i32) {
    %c0_i32 = arith.constant 0 : i32
    %c0_i32_0 = arith.constant 0 : i32
    %c0_i32_1 = arith.constant 0 : i32
    return %c0_i32, %c0_i32_0 : i32, i32
  }
  func.func @transform_4(%arg0: i32, %arg1: i32, %arg2: i32) -> (i32, i32, i32) {
    %c1_i32 = arith.constant 1 : i32
    %0 = arith.muli %arg1, %c1_i32 : i32
    %1 = arith.addi %0, %arg2 : i32
    %c0_i32 = arith.constant 0 : i32
    %c0_i32_0 = arith.constant 0 : i32
    return %arg0, %c0_i32, %1 : i32, i32, i32
  }
  func.func @transform_5(%arg0: i32, %arg1: i32, %arg2: i32) -> (i32, i32, i32) {
    %c1_i32 = arith.constant 1 : i32
    %0 = arith.muli %arg0, %c1_i32 : i32
    %1 = arith.addi %0, %arg1 : i32
    %c0_i32 = arith.constant 0 : i32
    %c0_i32_0 = arith.constant 0 : i32
    %c0_i32_1 = arith.constant 0 : i32
    return %1, %c0_i32, %c0_i32_0 : i32, i32, i32
  }
  func.func @transform_6(%arg0: i32, %arg1: i32, %arg2: i32) -> (i32, i32, i32) {
    %c1_i32 = arith.constant 1 : i32
    %0 = arith.muli %arg0, %c1_i32 : i32
    %1 = arith.addi %0, %arg1 : i32
    %c0_i32 = arith.constant 0 : i32
    %c0_i32_0 = arith.constant 0 : i32
    %c0_i32_1 = arith.constant 0 : i32
    return %1, %c0_i32, %c0_i32_0 : i32, i32, i32
  }
}

module attributes {stable_mosaic.version = 11 : i64} {
  func.func @_final_layer_kernel(%arg0: i32, %arg1: i32, %arg2: memref<1x8x128xbf16, #tpu.memory_space<vmem>>, %arg3: memref<8x1xf32, #tpu.memory_space<vmem>>, %arg4: memref<8x1xf32, #tpu.memory_space<vmem>>, %arg5: memref<2x8xbf16, #tpu.memory_space<vmem>>, %arg6: memref<2x1xf32, #tpu.memory_space<vmem>>, %arg7: memref<1x2x128xf32, #tpu.memory_space<vmem>>) attributes {dimension_semantics = [#tpu.dimension_semantics<parallel>, #tpu.dimension_semantics<parallel>], iteration_bounds = array<i64: 2, 1>, scalar_prefetch = 0 : i64, scratch_operands = 0 : i64, tpu.core_type = #tpu.core_type<tc>, window_params = [{transform_indices = @transform_0, window_bounds = array<i64: 1, 8, 128>}, {pipeline_mode = #tpu.pipeline_mode<synchronous>, transform_indices = @transform_1, window_bounds = array<i64: 8, 1>}, {pipeline_mode = #tpu.pipeline_mode<synchronous>, transform_indices = @transform_2, window_bounds = array<i64: 8, 1>}, {pipeline_mode = #tpu.pipeline_mode<synchronous>, transform_indices = @transform_3, window_bounds = array<i64: 2, 8>}, {pipeline_mode = #tpu.pipeline_mode<synchronous>, transform_indices = @transform_4, window_bounds = array<i64: 2, 1>}, {transform_indices = @transform_5, window_bounds = array<i64: 1, 2, 128>}]} {
    %c0 = arith.constant 0 : index
    %c0_0 = arith.constant 0 : index
    %0 = vector.load %arg3[%c0, %c0_0] : memref<8x1xf32, #tpu.memory_space<vmem>>, vector<8x1xf32>
    %c0_1 = arith.constant 0 : index
    %c0_2 = arith.constant 0 : index
    %c0_3 = arith.constant 0 : index
    %1 = vector.load %arg2[%c0_1, %c0_2, %c0_3] : memref<1x8x128xbf16, #tpu.memory_space<vmem>>, vector<1x8x128xbf16>
    %2 = vector.shape_cast %1 : vector<1x8x128xbf16> to vector<8x128xbf16>
    %3 = arith.extf %2 : vector<8x128xbf16> to vector<8x128xf32>
    %4 = vector.broadcast %0 : vector<8x1xf32> to vector<8x128xf32>
    %5 = arith.mulf %4, %3 : vector<8x128xf32>
    %c0_4 = arith.constant 0 : index
    %c0_5 = arith.constant 0 : index
    %6 = vector.load %arg4[%c0_4, %c0_5] : memref<8x1xf32, #tpu.memory_space<vmem>>, vector<8x1xf32>
    %7 = vector.broadcast %6 : vector<8x1xf32> to vector<8x128xf32>
    %8 = arith.addf %5, %7 : vector<8x128xf32>
    %cst = arith.constant 0.000000e+00 : f32
    %9 = vector.broadcast %cst : f32 to vector<8x128xf32>
    %10 = arith.maximumf %8, %9 : vector<8x128xf32>
    %c0_6 = arith.constant 0 : index
    %c0_7 = arith.constant 0 : index
    %11 = vector.load %arg5[%c0_6, %c0_7] : memref<2x8xbf16, #tpu.memory_space<vmem>>, vector<2x8xbf16>
    %12 = arith.truncf %10 : vector<8x128xf32> to vector<8x128xbf16>
    %cst_8 = arith.constant dense<0.000000e+00> : vector<2x128xf32>
    %13 = tpu.matmul %11, %12, %cst_8 {dimension_numbers = #tpu.dot_dimension_numbers<[1], [0], [0], [1], [0, 0, 1, 1], [], []>} : vector<2x8xbf16>, vector<8x128xbf16>, vector<2x128xf32> -> vector<2x128xf32>
    %c0_9 = arith.constant 0 : index
    %c0_10 = arith.constant 0 : index
    %14 = vector.load %arg6[%c0_9, %c0_10] : memref<2x1xf32, #tpu.memory_space<vmem>>, vector<2x1xf32>
    %15 = vector.broadcast %14 : vector<2x1xf32> to vector<2x128xf32>
    %16 = arith.addf %13, %15 : vector<2x128xf32>
    %17 = math.tanh %16 : vector<2x128xf32>
    %c0_11 = arith.constant 0 : index
    %c0_12 = arith.constant 0 : index
    %c0_13 = arith.constant 0 : index
    %18 = vector.load %arg7[%c0_11, %c0_12, %c0_13] : memref<1x2x128xf32, #tpu.memory_space<vmem>>, vector<1x2x128xf32>
    %19 = vector.shape_cast %18 : vector<1x2x128xf32> to vector<2x128xf32>
    %20 = vector.shape_cast %17 : vector<2x128xf32> to vector<1x2x128xf32>
    tpu.vector_store %arg7[%c0_11, %c0_12, %c0_13], %20 {strides = array<i32>} : memref<1x2x128xf32, #tpu.memory_space<vmem>>, vector<1x2x128xf32>,
    return
  }
  func.func @transform_0(%arg0: i32, %arg1: i32) -> (i32, i32, i32) {
    %c0_i32 = arith.constant 0 : i32
    %c0_i32_0 = arith.constant 0 : i32
    return %arg0, %c0_i32, %arg1 : i32, i32, i32
  }
  func.func @transform_1(%arg0: i32, %arg1: i32) -> (i32, i32) {
    %c0_i32 = arith.constant 0 : i32
    %c0_i32_0 = arith.constant 0 : i32
    %c0_i32_1 = arith.constant 0 : i32
    return %c0_i32, %c0_i32_0 : i32, i32
  }
  func.func @transform_2(%arg0: i32, %arg1: i32) -> (i32, i32) {
    %c0_i32 = arith.constant 0 : i32
    %c0_i32_0 = arith.constant 0 : i32
    %c0_i32_1 = arith.constant 0 : i32
    return %c0_i32, %c0_i32_0 : i32, i32
  }
  func.func @transform_3(%arg0: i32, %arg1: i32) -> (i32, i32) {
    %c0_i32 = arith.constant 0 : i32
    %c0_i32_0 = arith.constant 0 : i32
    %c0_i32_1 = arith.constant 0 : i32
    return %c0_i32, %c0_i32_0 : i32, i32
  }
  func.func @transform_4(%arg0: i32, %arg1: i32) -> (i32, i32) {
    %c0_i32 = arith.constant 0 : i32
    %c0_i32_0 = arith.constant 0 : i32
    %c0_i32_1 = arith.constant 0 : i32
    return %c0_i32, %c0_i32_0 : i32, i32
  }
  func.func @transform_5(%arg0: i32, %arg1: i32) -> (i32, i32, i32) {
    %c0_i32 = arith.constant 0 : i32
    %c0_i32_0 = arith.constant 0 : i32
    return %arg0, %c0_i32, %arg1 : i32, i32, i32
  }
}

</mosaic_0001>

<bundles_post_ra>
// kernel: refiner_forward.4
= control target key start
LH: loop header
LB: loop body
LE: loop exit
PB: predicated region body
PF: predicated region fallthrough
CT: control target
= control target key end

     0   :  { %s744_s15 = smov 0   ;;  %s746_s16 = smov 0   ;;  %s839_s0 = inlined_call_operand.vmem [shape: f32[2,32,128], index: 0, kind: input, shape index: {}]   ;;  %s840_s1 = inlined_call_operand.vmem [shape: bf16[32,32], index: 1, kind: input, shape index: {}]   ;;  %s841_s2 = inlined_call_operand.vmem [shape: bf16[2,32,128], index: 2, kind: output, shape index: {0}]   ;;  %s842_s3 = inlined_call_operand.vmem [shape: f32[2,32,1], index: 3, kind: output, shape index: {1}]   ;;  %s843_s4 = inlined_call_operand.vmem [shape: f32[2,32,1], index: 4, kind: output, shape index: {2}]  }
   0x1   :  { %s748_s17 = smov 0  }
   0x2 LB: > { %s34_s18 = sadd.s32 1, %s712_s16  ;;  %p617_p0 = scmp.ge.s32.totalorder %s716_s17, 1  ;;  %s716_s17 = sphi %s748_s17, %s15_s17   ;;  %s712_s16 = sphi %s746_s16, %s845_s16   ;;  %s708_s15 = sphi %s744_s15, %s844_s15  }
   0x3   : > { %p36_p1 = scmp.ge.s32.totalorder %s34_s18, 2  ;;  %p203_p2 = scmp.lt.s32.totalorder %s716_s17, 3 }
   0x5   : > { %s847_s18 = smov (%p36_p1, %s34_s18), 0  ;;  %p204_p3 = pnand %p617_p0, %p203_p2 }
   0x6   : > { %p250_p4 = scmp.lt.s32.totalorder (!%p204_p3), %s708_s15, 1  ;;  %v692_v0 = vld [vmem:[%s840_s1] sm:$0xff] (!%p204_p3)   ;;  %vm317_vm0 = vcmask (!%p204_p3), 261120   ;;  %v693_v7 = vld [vmem:[%s840_s1 + $0x8] sm:$0xff] (!%p204_p3)   ;;  %vm288_vm1 = vcmask (!%p204_p3), 7168   ;;  %v718_v8 = vmov (!%p204_p3), 0.0   ;;  %v395_v9 = vlaneseq (!%p204_p3) }
   0x7   : > { %207 = sbr.rel (%p204_p3) target bundleno = 399 (0x18f), region = 28  ;;  %663 = vmatprep.mubr.msk.bf16.mxu0 (!%p204_p3), %vm317_vm0, %v692_v0 }
   0x8   : > { %v396_v10 = vand.u32 (!%p204_p3), 127, %v395_v9 }
   0xa   : > { %vm399_vm2 = vcmp.lt.s32.totalorder (!%p204_p3), %v396_v10, 16 }
   0xe   : > { %s849_s15 = smov (!%p250_p4, %s708_s15), 1 }
   0xf   : > { %s636_s21 = sshll.u32 %s849_s15, 5  ;;  %s637_s7 = sshll.u32 %s849_s15, 4 }
  0x10   : > { %s257_s24 = scalar_lea.vmem %s839_s0, %s636_s21  ;;  %s779_s29 = scalar_lea.vmem %s842_s3, %s636_s21 }
  0x11   : > { %v297_v1 = vld [vmem:[%s257_s24] sm:$0xff]  ;;  %v298_v2 = vld [vmem:[%s257_s24 + $0x8] sm:$0xff]  ;;  %v299_v3 = vld [vmem:[%s257_s24 + $0x10] sm:$0xff]  ;;  %s784_s6 = scalar_lea.vmem %s843_s4, %s636_s21  ;;  %291 = vst.msk [vmem:[%s779_s29 + $0x10] sm:$0xff] %vm288_vm1, %v718_v8  ;;  %s267_s10 = scalar_lea.vmem %s841_s2, %s637_s7 }
  0x12   : > { %v305_v4 = vpack.c.bf16 %v298_v2, %v297_v1  ;;  %v300_v5 = vld [vmem:[%s257_s24 + $0x18] sm:$0xff]  ;;  %289 = vst.msk [vmem:[%s779_s29] sm:$0xff] %vm288_vm1, %v718_v8  ;;  %290 = vst.msk [vmem:[%s779_s29 + $0x8] sm:$0xff] %vm288_vm1, %v718_v8 }
  0x13   : > { %v306_v6 = vpack.c.bf16 %v300_v5, %v299_v3  ;;  %292 = vst.msk [vmem:[%s779_s29 + $0x18] sm:$0xff] %vm288_vm1, %v718_v8  ;;  %293 = vst.msk [vmem:[%s784_s6] sm:$0xff] %vm288_vm1, %v718_v8 }
  0x14   : > { %659 = vmatprep.subr.bf16.mxu0 %v305_v4  ;;  %294 = vst.msk [vmem:[%s784_s6 + $0x8] sm:$0xff] %vm288_vm1, %v718_v8  ;;  %295 = vst.msk [vmem:[%s784_s6 + $0x10] sm:$0xff] %vm288_vm1, %v718_v8 }
  0x15   : > { %660 = vmatpush3.bf16.msra.mxu0 %v305_v4  ;;  %296 = vst.msk [vmem:[%s784_s6 + $0x18] sm:$0xff] %vm288_vm1, %v718_v8 }
  0x16   : > { %661 = vmatprep.subr.bf16.mxu0 %v306_v6 }
  0x18   : > { %v408_v25 = vld [vmem:[%s779_s29 + $0x10] sm:$0xff] }
  0x19   : > { %662 = vmatpush3.bf16.msra.mxu0 %v306_v6  ;;  %v406_v26 = vld [vmem:[%s779_s29] sm:$0xff]  ;;  %v407_v32 = vld [vmem:[%s779_s29 + $0x8] sm:$0xff] }
  0x1a   : > { %v409_v31 = vld [vmem:[%s779_s29 + $0x18] sm:$0xff]  ;;  %v427_v38 = vld [vmem:[%s784_s6] sm:$0xff] }
  0x1b   : > { %v428_v37 = vld [vmem:[%s784_s6 + $0x8] sm:$0xff]  ;;  %v429_v44 = vld [vmem:[%s784_s6 + $0x10] sm:$0xff] }
  0x1c   : > { %664 = vmatmul.mubr.msk.bf16.vlgmr.msra.gmra.mrb[0].mxu0 %vm317_vm0, %v693_v7  ;;  %v430_v43 = vld [vmem:[%s784_s6 + $0x18] sm:$0xff] }
  0xef   : > { %v665_v11 = vpop.f32.mrb[0].mxu0 }
  0xf0   : > { %v358_v12 = vpop.f32.mrb[1].mxu0  ;;  %v404_v13 = vsel %vm399_vm2, %v665_v11, 0.0 }
  0xf1   : > { %414 = vadd.xlane.f32.xlu1 %v404_v13  ;;  %v666_v14 = vpop.f32.mrb[2].mxu0  ;;  %v402_v15 = vsel %vm399_vm2, %v358_v12, 0.0  ;;  %v433_v24 = vmul.f32 %v404_v13, %v404_v13 }
  0xf2   : > { %v652_v16 = vpack.c.bf16 %v666_v14, %v665_v11  ;;  %410 = vadd.xlane.f32.xlu0 %v402_v15  ;;  %v361_v17 = vpop.f32.mrb[3].mxu0  ;;  %v405_v19 = vsel %vm399_vm2, %v666_v14, 0.0  ;;  %v431_v22 = vmul.f32 %v402_v15, %v402_v15 }
  0xf3   : > { %v647_v18 = vpack.c.bf16 %v361_v17, %v358_v12  ;;  %v403_v20 = vsel %vm399_vm2, %v361_v17, 0.0  ;;  %v434_v23 = vmul.f32 %v405_v19, %v405_v19 }
  0xf4   : > { %654 = vst [vmem:[%s267_s10 + $0x8] sm:$0xff] %v652_v16   ;;  %v432_v21 = vmul.f32 %v403_v20, %v403_v20 }
  0xf5   : > { %648 = vst [vmem:[%s267_s10] sm:$0xff] %v647_v18   ;;  %416 = vadd.xlane.f32.xlu1 %v405_v19 }
  0xf6   : > { %412 = vadd.xlane.f32.xlu0 %v403_v20 }
  0xf9   : > { %437 = vadd.xlane.f32.xlu1 %v432_v21 }
  0xfa   : > { %435 = vadd.xlane.f32.xlu0 %v431_v22 }
  0xfd   : > { %441 = vadd.xlane.f32.xlu1 %v434_v23 }
  0xfe   : > { %439 = vadd.xlane.f32.xlu0 %v433_v24 }
 0x17e   : > { %v415_v27 = vpop.xlane.xlu1 %414 }
 0x17f   : > { %v420_v28 = vadd.f32 %v415_v27, %v408_v25  ;;  %v411_v29 = vpop.xlane.xlu0 %410 }
 0x180   : > { %v418_v30 = vadd.f32 %v411_v29, %v406_v26 }
 0x181   : > { %425 = vst.msk [vmem:[%s779_s29 + $0x10] sm:$0xff] %vm288_vm1, %v420_v28 }
 0x182   : > { %423 = vst.msk [vmem:[%s779_s29] sm:$0xff] %vm288_vm1, %v418_v30  ;;  %v417_v33 = vpop.xlane.xlu1 %416 }
 0x183   : > { %v421_v34 = vadd.f32 %v417_v33, %v409_v31  ;;  %v413_v35 = vpop.xlane.xlu0 %412 }
 0x184   : > { %v419_v36 = vadd.f32 %v413_v35, %v407_v32 }
 0x185   : > { %426 = vst.msk [vmem:[%s779_s29 + $0x18] sm:$0xff] %vm288_vm1, %v421_v34 }
 0x186   : > { %424 = vst.msk [vmem:[%s779_s29 + $0x8] sm:$0xff] %vm288_vm1, %v419_v36  ;;  %v438_v39 = vpop.xlane.xlu1 %437 }
 0x187   : > { %v444_v40 = vadd.f32 %v438_v39, %v428_v37  ;;  %v436_v41 = vpop.xlane.xlu0 %435 }
 0x188   : > { %v443_v42 = vadd.f32 %v436_v41, %v427_v38 }
 0x189   : > { %448 = vst.msk [vmem:[%s784_s6 + $0x8] sm:$0xff] %vm288_vm1, %v444_v40 }
 0x18a   : > { %447 = vst.msk [vmem:[%s784_s6] sm:$0xff] %vm288_vm1, %v443_v42  ;;  %v442_v45 = vpop.xlane.xlu1 %441 }
 0x18b   : > { %v446_v46 = vadd.f32 %v442_v45, %v430_v43  ;;  %v440_v47 = vpop.xlane.xlu0 %439 }
 0x18c   : > { %v445_v48 = vadd.f32 %v440_v47, %v429_v44 }
 0x18d   : > { %450 = vst.msk [vmem:[%s784_s6 + $0x18] sm:$0xff] %vm288_vm1, %v446_v46 }
 0x18e   : > { %449 = vst.msk [vmem:[%s784_s6 + $0x10] sm:$0xff] %vm288_vm1, %v445_v48 }
 0x18f PF: > { %s15_s17 = sadd.s32 1, %s716_s17   ;;  %s844_s15 = smov %s712_s16 }
 0x190   : > { %p12_p5 = scmp.ge.s32.totalorder %s15_s17, 4   ;;  %s845_s16 = smov %s847_s18 }
 0x192   :  { %14 = sbr.rel (!%p12_p5) target bundleno = 2 (0x2), region = 86 }

// kernel: refiner_forward.5
= control target key start
LH: loop header
LB: loop body
LE: loop exit
PB: predicated region body
PF: predicated region fallthrough
CT: control target
= control target key end

     0   :  { %s817_s21 = smov 0   ;;  %s819_s22 = smov 0   ;;  %s920_s0 = inlined_call_operand.vmem [shape: bf16[2,32,128], index: 0, kind: input, shape index: {}]   ;;  %s921_s1 = inlined_call_operand.vmem [shape: f32[32,1], index: 1, kind: input, shape index: {}]   ;;  %s922_s2 = inlined_call_operand.vmem [shape: f32[32,1], index: 2, kind: input, shape index: {}]   ;;  %s923_s3 = inlined_call_operand.vmem [shape: bf16[16,32], index: 3, kind: input, shape index: {}]   ;;  %s924_s4 = inlined_call_operand.vmem [shape: bf16[2,16,128], index: 4, kind: output, shape index: {0}]   ;;  %s925_s5 = inlined_call_operand.vmem [shape: f32[2,16,1], index: 5, kind: output, shape index: {1}]   ;;  %s926_s6 = inlined_call_operand.vmem [shape: f32[2,16,1], index: 6, kind: output, shape index: {2}]  }
   0x1   :  { %s821_s23 = smov 0  }
   0x2 LB: > { %s36_s24 = sadd.s32 1, %s773_s22  ;;  %p679_p0 = scmp.ge.s32.totalorder %s777_s23, 1  ;;  %s777_s23 = sphi %s821_s23, %s17_s23   ;;  %s773_s22 = sphi %s819_s22, %s928_s22   ;;  %s769_s21 = sphi %s817_s21, %s927_s21  }
   0x3   : > { %p38_p1 = scmp.ge.s32.totalorder %s36_s24, 2  ;;  %p253_p2 = scmp.lt.s32.totalorder %s777_s23, 3 }
   0x5   : > { %s930_s24 = smov (%p38_p1, %s36_s24), 0  ;;  %p254_p3 = pnand %p679_p0, %p253_p2 }
   0x6   : > { %v383_v0 = vld [vmem:[%s922_s2] sm:$0xff] (!%p254_p3)  ;;  %v779_v2 = vmov (!%p254_p3), 0   ;;  %v384_v3 = vld [vmem:[%s922_s2 + $0x8] sm:$0xff] (!%p254_p3)  ;;  %v358_v5 = vld [vmem:[%s921_s1 + $0x18] sm:$0xff] (!%p254_p3)  ;;  %v780_v9 = vmov (!%p254_p3), 0.0   ;;  %vm781_vm0 = vmmov (!%p254_p3), 0   ;;  %v481_v39 = vlaneseq (!%p254_p3) }
   0x7   : > { %257 = sbr.rel (%p254_p3) target bundleno = 523 (0x20b), region = 36  ;;  %v355_v1 = vld [vmem:[%s921_s1] sm:$0xff] (!%p254_p3)  ;;  %753 = vset.pattern.permute.xlu1 (!%p254_p3), %v779_v2  ;;  %752 = vset.pattern.permute.xlu0 (!%p254_p3), %v779_v2  ;;  %v356_v4 = vld [vmem:[%s921_s1 + $0x8] sm:$0xff] (!%p254_p3)  ;;  %v357_v6 = vld [vmem:[%s921_s1 + $0x10] sm:$0xff] (!%p254_p3)  ;;  %p304_p4 = scmp.lt.s32.totalorder (!%p254_p3), %s769_s21, 1  ;;  %vm424_vm1 = vcmask (!%p254_p3), 261120  }
   0x8   : > { %389 = vperm.xlu1 (!%p254_p3), %753, %v383_v0   ;;  %361 = vperm.xlu0 (!%p254_p3), %752, %v355_v1   ;;  %v386_v7 = vld [vmem:[%s922_s2 + $0x18] sm:$0xff] (!%p254_p3)  ;;  %v385_v8 = vld [vmem:[%s922_s2 + $0x10] sm:$0xff] (!%p254_p3)  ;;  %v754_v38 = vld [vmem:[%s923_s3] sm:$0xff] (!%p254_p3)   ;;  %vm342_vm2 = vcmask (!%p254_p3), 7168   ;;  %v482_v40 = vand.u32 (!%p254_p3), 127, %v481_v39 }
   0x9   : > { %717 = vmatprep.subr.bf16.mxu0 (!%p254_p3), %v780_v9  ;;  %721 = vmatprep.mubr.msk.bf16.mxu0 (!%p254_p3), %vm781_vm0, %v780_v9 }
   0xa   : > { %vm485_vm3 = vcmp.lt.s32.totalorder (!%p254_p3), %v482_v40, 16 }
   0xc   : > { %394 = vperm.xlu1 (!%p254_p3), %753, %v384_v3   ;;  %366 = vperm.xlu0 (!%p254_p3), %752, %v356_v4  }
   0xe   : > { %s932_s21 = smov (!%p304_p4, %s769_s21), 1 }
   0xf   : > { %s866_s17 = sshll.u32 %s932_s21, 4  ;;  %s695_s9 = sshll.u32 %s932_s21, 3 }
  0x10   : > { %376 = vperm.xlu1 %753, %v358_v5   ;;  %371 = vperm.xlu0 %752, %v357_v6   ;;  %s311_s20 = scalar_lea.vmem %s920_s0, %s866_s17  ;;  %s879_s29 = scalar_lea.vmem %s925_s5, %s866_s17 }
  0x11   : > { %v701_v10 = vld [vmem:[%s311_s20] sm:$0xff]   ;;  %v713_v18 = vld [vmem:[%s311_s20 + $0x8] sm:$0xff]   ;;  %s885_s8 = scalar_lea.vmem %s926_s6, %s866_s17  ;;  %343 = vst.msk [vmem:[%s879_s29] sm:$0xff] %vm342_vm2, %v780_v9  ;;  %344 = vst.msk [vmem:[%s879_s29 + $0x8] sm:$0xff] %vm342_vm2, %v780_v9  ;;  %s321_s12 = scalar_lea.vmem %s924_s4, %s695_s9 }
  0x12   : > { %v702_v11 = vunpack.c.l.bf16 %v701_v10  ;;  %v703_v15 = vunpack.c.h.bf16 %v701_v10  ;;  %v707_v22 = vunpack.c.h.bf16 %v713_v18  ;;  %v706_v23 = vunpack.c.l.bf16 %v713_v18  ;;  %345 = vst.msk [vmem:[%s885_s8] sm:$0xff] %vm342_vm2, %v780_v9  ;;  %346 = vst.msk [vmem:[%s885_s8 + $0x8] sm:$0xff] %vm342_vm2, %v780_v9 }
  0x14   : > { %404 = vperm.xlu1 %753, %v386_v7   ;;  %399 = vperm.xlu0 %752, %v385_v8  }
  0x18   : > { %v490_v50 = vld [vmem:[%s879_s29] sm:$0xff]  ;;  %v491_v52 = vld [vmem:[%s879_s29 + $0x8] sm:$0xff] }
  0x19   : > { %v501_v55 = vld [vmem:[%s885_s8] sm:$0xff]  ;;  %v502_v59 = vld [vmem:[%s885_s8 + $0x8] sm:$0xff] }
  0x87   : > { %v390_v12 = vpop.permute.xlu1 %389  ;;  %v362_v13 = vpop.permute.xlu0 %361 }
  0x88   : > { %v379_v14 = vmul.f32 %v702_v11, %v362_v13 }
  0x8a   : > { %v407_v19 = vadd.f32 %v390_v12, %v379_v14 }
  0x8b   : > { %v395_v16 = vpop.permute.xlu1 %394  ;;  %v367_v17 = vpop.permute.xlu0 %366 }
  0x8c   : > { %v380_v20 = vmul.f32 %v703_v15, %v367_v17  ;;  %v411_v26 = vmax.f32 %v407_v19, 0.0 }
  0x8e   : > { %v408_v21 = vadd.f32 %v395_v16, %v380_v20 }
  0x8f   : > { %v377_v24 = vpop.permute.xlu1 %376  ;;  %v372_v25 = vpop.permute.xlu0 %371 }
  0x90   : > { %v412_v27 = vmax.f32 %v408_v21, 0.0  ;;  %v382_v28 = vmul.f32 %v707_v22, %v377_v24  ;;  %v381_v29 = vmul.f32 %v706_v23, %v372_v25 }
  0x92   : > { %v417_v30 = vpack.c.bf16 %v412_v27, %v411_v26 }
  0x93   : > { %v405_v31 = vpop.permute.xlu1 %404  ;;  %v400_v32 = vpop.permute.xlu0 %399 }
  0x94   : > { %v410_v33 = vadd.f32 %v405_v31, %v382_v28  ;;  %v409_v34 = vadd.f32 %v400_v32, %v381_v29  ;;  %718 = vmatpush3.bf16.msra.mxu0 %v417_v30 }
  0x95   : > { %719 = vmatprep.subr.bf16.mxu0 %v780_v9 }
  0x96   : > { %v414_v35 = vmax.f32 %v410_v33, 0.0  ;;  %v413_v36 = vmax.f32 %v409_v34, 0.0 }
  0x98   : > { %v418_v37 = vpack.c.bf16 %v414_v35, %v413_v36 }
  0x9a   : > { %720 = vmatpush3.bf16.msra.mxu0 %v418_v37 }
  0x9d   : > { %722 = vmatmul.mubr.msk.bf16.vlgmr.msra.gmra.mrb[0].mxu0 %vm424_vm1, %v754_v38 }
 0x170   : > { %v462_v41 = vpop.f32.mrb[0].mxu0 }
 0x171   : > { %v723_v42 = vpop.f32.mrb[1].mxu0  ;;  %v488_v43 = vsel %vm485_vm3, %v462_v41, 0.0 }
 0x172   : > { %492 = vadd.xlane.f32.xlu0 %v488_v43  ;;  %v465_v44 = vpop.f32.mrb[2].mxu0  ;;  %v503_v48 = vmul.f32 %v488_v43, %v488_v43 }
 0x173   : > { %v711_v45 = vpack.c.bf16 %v465_v44, %v462_v41  ;;  %v724_v46 = vpop.f32.mrb[3].mxu0  ;;  %v489_v47 = vsel %vm485_vm3, %v465_v44, 0.0 }
 0x174   : > { %494 = vadd.xlane.f32.xlu1 %v489_v47  ;;  %v504_v49 = vmul.f32 %v489_v47, %v489_v47 }
 0x175   : > { %712 = vst [vmem:[%s321_s12] sm:$0xff] %v711_v45  }
 0x176   : > { %505 = vadd.xlane.f32.xlu0 %v503_v48 }
 0x17a   : > { %507 = vadd.xlane.f32.xlu0 %v504_v49 }
 0x1ff   : > { %v493_v51 = vpop.xlane.xlu0 %492 }
 0x200   : > { %v496_v53 = vadd.f32 %v493_v51, %v490_v50 }
 0x201   : > { %v495_v54 = vpop.xlane.xlu1 %494 }
 0x202   : > { %499 = vst.msk [vmem:[%s879_s29] sm:$0xff] %vm342_vm2, %v496_v53  ;;  %v497_v56 = vadd.f32 %v495_v54, %v491_v52 }
 0x203   : > { %v506_v57 = vpop.xlane.xlu0 %505 }
 0x204   : > { %500 = vst.msk [vmem:[%s879_s29 + $0x8] sm:$0xff] %vm342_vm2, %v497_v56  ;;  %v509_v58 = vadd.f32 %v506_v57, %v501_v55 }
 0x206   : > { %511 = vst.msk [vmem:[%s885_s8] sm:$0xff] %vm342_vm2, %v509_v58 }
 0x207   : > { %v508_v60 = vpop.xlane.xlu0 %507 }
 0x208   : > { %v510_v61 = vadd.f32 %v508_v60, %v502_v59 }
 0x20a   : > { %512 = vst.msk [vmem:[%s885_s8 + $0x8] sm:$0xff] %vm342_vm2, %v510_v61 }
 0x20b PF: > { %s17_s23 = sadd.s32 1, %s777_s23   ;;  %s927_s21 = smov %s773_s22 }
 0x20c   : > { %p14_p5 = scmp.ge.s32.totalorder %s17_s23, 4   ;;  %s928_s22 = smov %s930_s24 }
 0x20e   :  { %16 = sbr.rel (!%p14_p5) target bundleno = 2 (0x2), region = 94 }

// kernel: refiner_forward.6
= control target key start
LH: loop header
LB: loop body
LE: loop exit
PB: predicated region body
PF: predicated region fallthrough
CT: control target
= control target key end

     0   :  { %s712_s21 = smov 0   ;;  %s714_s22 = smov 0   ;;  %s779_s0 = inlined_call_operand.vmem [shape: bf16[2,16,128], index: 0, kind: input, shape index: {}]   ;;  %s780_s1 = inlined_call_operand.vmem [shape: f32[16,1], index: 1, kind: input, shape index: {}]   ;;  %s781_s2 = inlined_call_operand.vmem [shape: f32[16,1], index: 2, kind: input, shape index: {}]   ;;  %s782_s3 = inlined_call_operand.vmem [shape: bf16[8,16], index: 3, kind: input, shape index: {}]   ;;  %s783_s4 = inlined_call_operand.vmem [shape: bf16[2,8,128], index: 4, kind: output, shape index: {0}]   ;;  %s784_s5 = inlined_call_operand.vmem [shape: f32[2,8,1], index: 5, kind: output, shape index: {1}]   ;;  %s785_s6 = inlined_call_operand.vmem [shape: f32[2,8,1], index: 6, kind: output, shape index: {2}]  }
   0x1   :  { %s716_s23 = smov 0  }
   0x2 LB: > { %s36_s24 = sadd.s32 1, %s668_s22  ;;  %p599_p0 = scmp.ge.s32.totalorder %s672_s23, 1  ;;  %s672_s23 = sphi %s716_s23, %s17_s23   ;;  %s668_s22 = sphi %s714_s22, %s787_s22   ;;  %s664_s21 = sphi %s712_s21, %s786_s21  }
   0x3   : > { %p38_p1 = scmp.ge.s32.totalorder %s36_s24, 2  ;;  %p253_p2 = scmp.lt.s32.totalorder %s672_s23, 3 }
   0x5   : > { %s789_s24 = smov (%p38_p1, %s36_s24), 0  ;;  %p254_p3 = pnand %p599_p0, %p253_p2 }
   0x6   : > { %v357_v0 = vld [vmem:[%s781_s2] sm:$0xff] (!%p254_p3)  ;;  %v674_v2 = vmov (!%p254_p3), 0   ;;  %v358_v3 = vld [vmem:[%s781_s2 + $0x8] sm:$0xff] (!%p254_p3)  ;;  %v675_v5 = vmov (!%p254_p3), 0.0   ;;  %vm676_vm0 = vmmov (!%p254_p3), 0   ;;  %p301_p4 = scmp.lt.s32.totalorder (!%p254_p3), %s664_s21, 1  ;;  %v423_v21 = vlaneseq (!%p254_p3) }
   0x7   : > { %257 = sbr.rel (%p254_p3) target bundleno = 511 (0x1ff), region = 36  ;;  %v343_v1 = vld [vmem:[%s780_s1] sm:$0xff] (!%p254_p3)  ;;  %649 = vset.pattern.permute.xlu1 (!%p254_p3), %v674_v2  ;;  %648 = vset.pattern.permute.xlu0 (!%p254_p3), %v674_v2  ;;  %v344_v4 = vld [vmem:[%s780_s1 + $0x8] sm:$0xff] (!%p254_p3)  ;;  %vm375_vm1 = vcmask (!%p254_p3), 130048   ;;  %vm336_vm2 = vcmask (!%p254_p3), 7168  }
   0x8   : > { %361 = vperm.xlu1 (!%p254_p3), %649, %v357_v0   ;;  %347 = vperm.xlu0 (!%p254_p3), %648, %v343_v1   ;;  %v373_v20 = vld [vmem:[%s782_s3] sm:$0xf] (!%p254_p3)  ;;  %v424_v22 = vand.u32 (!%p254_p3), 127, %v423_v21 }
   0x9   : > { %615 = vmatprep.subr.bf16.mxu0 (!%p254_p3), %v675_v5  ;;  %617 = vmatprep.mubr.msk.bf16.mxu0 (!%p254_p3), %vm676_vm0, %v675_v5 }
   0xa   : > { %vm427_vm3 = vcmp.lt.s32.totalorder (!%p254_p3), %v424_v22, 16 }
   0xc   : > { %366 = vperm.xlu1 (!%p254_p3), %649, %v358_v3   ;;  %352 = vperm.xlu0 (!%p254_p3), %648, %v344_v4  }
   0xe   : > { %s791_s21 = smov (!%p301_p4, %s664_s21), 1 }
   0xf   : > { %s745_s9 = sshll.u32 %s791_s21, 3  ;;  %s602_s18 = sshll.u32 %s791_s21, 2 }
  0x10   : > { %s308_s12 = scalar_lea.vmem %s779_s0, %s745_s9  ;;  %s323_s17 = scalar_lea.vmem %s784_s5, %s745_s9 }
  0x11   : > { %v610_v6 = vld [vmem:[%s308_s12] sm:$0xff]   ;;  %337 = vst.msk [vmem:[%s323_s17] sm:$0xff] %vm336_vm2, %v675_v5  ;;  %s317_s25 = scalar_lea.vmem %s783_s4, %s602_s18  ;;  %s329_s28 = scalar_lea.vmem %s785_s6, %s745_s9 }
  0x12   : > { %v611_v7 = vunpack.c.l.bf16 %v610_v6  ;;  %v612_v11 = vunpack.c.h.bf16 %v610_v6  ;;  %338 = vst.msk [vmem:[%s329_s28] sm:$0xff] %vm336_vm2, %v675_v5 }
  0x18   : > { %v431_v30 = vld [vmem:[%s323_s17] sm:$0xff] }
  0x19   : > { %v437_v32 = vld [vmem:[%s329_s28] sm:$0xff] }
  0x87   : > { %v362_v8 = vpop.permute.xlu1 %361  ;;  %v348_v9 = vpop.permute.xlu0 %347 }
  0x88   : > { %v355_v10 = vmul.f32 %v611_v7, %v348_v9 }
  0x8a   : > { %v369_v13 = vadd.f32 %v362_v8, %v355_v10 }
  0x8b   : > { %v353_v12 = vpop.permute.xlu0 %352  ;;  %v367_v15 = vpop.permute.xlu1 %366 }
  0x8c   : > { %v356_v14 = vmul.f32 %v612_v11, %v353_v12  ;;  %v371_v17 = vmax.f32 %v369_v13, 0.0 }
  0x8e   : > { %v370_v16 = vadd.f32 %v367_v15, %v356_v14 }
  0x90   : > { %v372_v18 = vmax.f32 %v370_v16, 0.0 }
  0x92   : > { %v374_v19 = vpack.c.bf16 %v372_v18, %v371_v17 }
  0x94   : > { %616 = vmatpush3.bf16.msra.mxu0 %v374_v19 }
  0x97   : > { %618 = vmatmul.mubr.msk.bf16.vlgmr.msra.gmra.mrb[0].mxu0 %vm375_vm1, %v373_v20 }
 0x16a   : > { %v413_v23 = vpop.f32.mrb[0].mxu0 }
 0x16b   : > { %v419_v24 = vpack.c.bf16 %v413_v23, %v413_v23  ;;  %v619_v25 = vpop.f32.mrb[1].mxu0  ;;  %v430_v26 = vsel %vm427_vm3, %v413_v23, 0.0 }
 0x16c   : > { %432 = vadd.xlane.f32.xlu0 %v430_v26  ;;  %v416_v27 = vpop.f32.mrb[2].mxu0  ;;  %v438_v28 = vmul.f32 %v430_v26, %v430_v26 }
 0x16d   : > { %420 = vst [vmem:[%s317_s25] sm:$0xf] %v419_v24  ;;  %v620_v29 = vpop.f32.mrb[3].mxu0 }
 0x16e   : > { %439 = vadd.xlane.f32.xlu1 %v438_v28 }
 0x1f9   : > { %v433_v31 = vpop.xlane.xlu0 %432 }
 0x1fa   : > { %v434_v33 = vadd.f32 %v433_v31, %v431_v30 }
 0x1fb   : > { %v440_v34 = vpop.xlane.xlu1 %439 }
 0x1fc   : > { %436 = vst.msk [vmem:[%s323_s17] sm:$0xff] %vm336_vm2, %v434_v33  ;;  %v441_v35 = vadd.f32 %v440_v34, %v437_v32 }
 0x1fe   : > { %442 = vst.msk [vmem:[%s329_s28] sm:$0xff] %vm336_vm2, %v441_v35 }
 0x1ff PF: > { %s17_s23 = sadd.s32 1, %s672_s23   ;;  %s786_s21 = smov %s668_s22 }
 0x200   : > { %p14_p5 = scmp.ge.s32.totalorder %s17_s23, 4   ;;  %s787_s22 = smov %s789_s24 }
 0x202   :  { %16 = sbr.rel (!%p14_p5) target bundleno = 2 (0x2), region = 94 }

// kernel: refiner_forward.7
= control target key start
LH: loop header
LB: loop body
LE: loop exit
PB: predicated region body
PF: predicated region fallthrough
CT: control target
= control target key end

     0   :  { %10 = vsyncpa [#allocation3], 0  ;;  %s727_s0 = inlined_call_operand.vmem [shape: bf16[2,8,128], index: 0, kind: input, shape index: {}]   ;;  %s728_s1 = inlined_call_operand.vmem [shape: f32[8,1], index: 1, kind: input, shape index: {}]   ;;  %s729_s2 = inlined_call_operand.vmem [shape: f32[8,1], index: 2, kind: input, shape index: {}]   ;;  %s730_s3 = inlined_call_operand.vmem [shape: bf16[2,8], index: 3, kind: input, shape index: {}]   ;;  %s731_s4 = inlined_call_operand.vmem [shape: f32[2,1], index: 4, kind: input, shape index: {}]   ;;  %s732_s5 = inlined_call_operand.hbm [shape: f32[2,2,128], index: 5, kind: output, shape index: {}]  }
   0x1   :  { %12 = vsyncpa [#allocation3 + $0x1], 0  ;;  %s603_s18 = smov 0   ;;  %s605_s19 = smov 0  }
   0x2   :  { %s607_s20 = smov 0   ;;  %s609_s21 = smov 0  }
   0x3   :  { %s611_s22 = smov 0   ;;  %s613_s23 = smov 0  }
   0x4 LB: > { %s407_s24 = sadd.s32 4294967295, %s567_s23   ;;  %s408_s25 = sadd.s32 4294967294, %s567_s23   ;;  %s567_s23 = sphi %s613_s23, %s18_s23   ;;  %s563_s22 = sphi %s611_s22, %s739_s22   ;;  %s559_s21 = sphi %s609_s21, %s738_s21   ;;  %s555_s20 = sphi %s607_s20, %s737_s20   ;;  %s551_s19 = sphi %s605_s19, %s736_s19   ;;  %s547_s18 = sphi %s603_s18, %s735_s18  }
   0x5   : > { %s30_s26 = sadd.s32 1, %s563_s22  ;;  %s151_s27 = sadd.s32 1, %s555_s20 }
   0x6   : > { %p32_p0 = scmp.ge.s32.totalorder %s30_s26, 2  ;;  %p161_p1 = scmp.ne.s32.totalorder %s555_s20, %s551_s19 }
   0x7   : > { %p162_p2 = scmp.eq.s32.totalorder %s407_s24, 1  ;;  %p167_p3 = scmp.ne.s32.totalorder %s551_s19, %s547_s18 }
   0x8   : > { %s741_s26 = smov (%p32_p0, %s30_s26), 0  ;;  %p168_p5 = scmp.eq.s32.totalorder %s408_s25, 1 }
   0x9   : > { %p643_p4 = por %p162_p2, %p161_p1  ;;  %s146_s29 = ssub.s32 %s563_s22, %s741_s26 }
   0xa   : > { %p411_p6 = scmp.ge.s32.totalorder %s567_s23, 1  ;;  %p149_p7 = scmp.eq.s32.totalorder %s146_s29, 0 }
   0xb   : > { %p650_p8 = por %p168_p5, %p167_p3  ;;  %p208_p9 = scmp.lt.s32.totalorder %s567_s23, 3 }
   0xc   : > { %s656_s6 = scalar_select %p149_p7, %s555_s20, %s151_s27  }
   0xd   : > { %p209_p10 = pnand %p411_p6, %p208_p9 }
   0xe   : > { %v246_v0 = vld [vmem:[%s728_s1] sm:$0xff] (!%p209_p10)  ;;  %v569_v1 = vmov (!%p209_p10), 0   ;;  %v570_v3 = vmov (!%p209_p10), 0.0   ;;  %vm571_vm0 = vmmov (!%p209_p10), 0   ;;  %p238_p11 = scmp.lt.s32.totalorder (!%p209_p10), %s559_s21, 1  ;;  %vm275_vm1 = vcmask (!%p209_p10), 1043456  }
   0xf   : > { %212 = sbr.rel (%p209_p10) target bundleno = 397 (0x18d), region = 40  ;;  %485 = vset.pattern.permute.xlu0 (!%p209_p10), %v569_v1  ;;  %486 = vset.pattern.permute.xlu1 (!%p209_p10), %v569_v1  ;;  %v255_v2 = vld [vmem:[%s729_s2] sm:$0xff] (!%p209_p10)  ;;  %vm271_vm2 = vcmask (!%p209_p10), 64512   ;;  %s235_s27 = sand.u32 (!%p209_p10), 1, %s551_s19  }
  0x10   : > { %251 = vperm.xlu0 (!%p209_p10), %485, %v246_v0   ;;  %421 = vmatprep.subr.bf16.mxu0 (!%p209_p10), %v570_v3  ;;  %v265_v4 = vld [vmem:[%s731_s4] sm:$0x3] (!%p209_p10)  ;;  %s412_s29 = sshll.u32 (!%p209_p10), %s235_s27, 1  ;;  %s416_s7 = sshll.u32 (!%p209_p10), %s559_s21, 5 }
  0x11   : > { %423 = vmatprep.mubr.msk.bf16.mxu0 (!%p209_p10), %vm571_vm0, %v570_v3  ;;  %268 = vperm.xlu1 (!%p209_p10), %486, %v265_v4   ;;  %v263_v14 = vld [vmem:[%s730_s3] sm:$0x1] (!%p209_p10)  ;;  %s237_s8 = scalar_lea.vmem (!%p209_p10), [#allocation2], %s412_s29  ;;  %s680_s12 = scalar_lea.hbm (!%p209_p10), %s732_s5, %s416_s7 }
  0x12   : > { %s336_s9 = sshll.u32 (!%p209_p10), %s237_s8, 4  ;;  %s682_s9 = int_to_ptr.vmem [resolvable:$true] %s336_s9 }
  0x14   : > { %258 = vperm.xlu0 (!%p209_p10), %485, %v255_v2  }
  0x16   : > { %s239_s13 = scalar_select %p238_p11, %s559_s21, 1 }
  0x17   : > { %s572_s21 = smov [#allocation2]  }
  0x18   : > { %s413_s14 = sshll.u32 %s239_s13, 2  ;;  %s322_s13 = scalar_lea.sflag [#allocation3], %s235_s27 }
  0x19   : > { %s244_s17 = scalar_lea.vmem %s727_s0, %s413_s14  ;;  %s489_s14 = scalar_lea.vmem %s682_s9, 32 }
  0x1a   : > { %v247_v5 = vld [vmem:[%s244_s17] sm:$0xf]  ;;  %p490_p12 = scmp.ne.s32.totalorder %s682_s9, %s489_s14  ;;  %s493_s15 = sshll.u32 %s572_s21, 4  ;;  %s494_s15 = int_to_ptr.vmem [resolvable:$false] %s493_s15 }
  0x1b   : > { %v248_v6 = vunpack.c.l.bf16 %v247_v5  ;;  %s495_s16 = scalar_lea.vmem %s494_s15, 64  ;;  %p496_p1 = scmp.lt.s32.totalorder %s682_s9, %s494_s15 }
  0x1c   : > { %p491_p13 = pnand %p490_p12, %p643_p4  ;;  %p497_p2 = scmp.lt.s32.totalorder %s495_s16, %s489_s14 }
  0x1e   : > { %p492_p0 = pneg %p491_p13  ;;  %p498_p3 = por %p497_p2, %p496_p1 }
  0x20   : > { %p499_p5 = pnand %p498_p3, %p492_p0 }
  0x8f   : > { %v252_v7 = vpop.permute.xlu0 %251 }
  0x90   : > { %v254_v8 = vmul.f32 %v252_v7, %v248_v6  ;;  %v269_v15 = vpop.permute.xlu1 %268 }
  0x93   : > { %v259_v9 = vpop.permute.xlu0 %258 }
  0x94   : > { %v261_v10 = vadd.f32 %v259_v9, %v254_v8 }
  0x96   : > { %v262_v11 = vmax.f32 %v261_v10, 0.0 }
  0x98   : > { %v264_v12 = vpack.c.bf16 %v262_v11, %v262_v11 }
  0x9a   : > { %v277_v13 = vsel %vm275_vm1, %v264_v12, 0 }
  0x9b   : > { %422 = vmatpush3.bf16.msra.mxu0 %v277_v13 }
  0x9e   : > { %424 = vmatmul.mubr.msk.bf16.vlgmr.msra.gmra.mrb[0].mxu0 %vm271_vm2, %v263_v14 }
 0x171   : > { %v313_v16 = vpop.f32.mrb[0].mxu0 }
 0x172   : > { %v314_v17 = vadd.f32 %v313_v16, %v269_v15  ;;  %v425_v18 = vpop.f32.mrb[1].mxu0 }
 0x173   : > { %v316_v19 = vpop.f32.mrb[2].mxu0 }
 0x174   : > { %487 = vtanh.f32 %v314_v17  ;;  %v426_v20 = vpop.f32.mrb[3].mxu0 }
 0x17e   : > { %v488_v21 = vpop.eup %487 }
 0x17f   : > { %320 = vst [vmem:[%s237_s8] sm:$0x3] %v488_v21 }
 0x180   : > { %502 = shalt.err (!%p499_p5)
}
 0x181   : > { %s503_s17 = scalar_lea.hbm %s680_s12, 32  ;;  %s507_s27 = scalar_lea.hbm %s732_s5, 64 }
 0x182   : > { %p504_p6 = scmp.ne.s32.totalorder %s680_s12, %s503_s17  ;;  %p508_p10 = scmp.lt.u32.totalorder %s680_s12, %s732_s5 }
 0x183   : > { %p509_p11 = scmp.lt.u32.totalorder %s507_s27, %s503_s17  ;;  %p511_p13 = scmp.lt.u32.totalorder %s503_s17, %s680_s12 }
 0x184   : > { %p505_p7 = pnand %p504_p6, %p643_p4 }
 0x185   : > { %p510_p12 = por %p509_p11, %p508_p10 }
 0x186   : > { %p506_p9 = pneg %p505_p7 }
 0x187   : > { %p512_p0 = por %p511_p13, %p510_p12 }
 0x189   : > { %p513_p1 = pnand %p512_p0, %p506_p9 }
 0x18b   : > { %516 = shalt.err (!%p513_p1)
}
 0x18c   : > { %427 = dma.vmem_to_hbm [thread:$0]  (%p643_p4), %s682_s9, 32, %s680_s12, %s322_s13  }
 0x18d PF: > { %p433_p2 = scmp.ge.s32.totalorder %s567_s23, 2  ;;  %s348_s8 = sand.u32 1, %s547_s18  }
 0x18e   : > { %s349_s10 = scalar_lea.sflag [#allocation3], %s348_s8 }
 0x18f   : > { %p430_p3 = pnand %p433_p2, %p650_p8 }
 0x191   : > { %542 = dma.done.wait (!%p430_p3), %s349_s10, 32  }
 0x192   : > { %544 = vsyncadd (!%p430_p3), %s349_s10, 4294967264  ;;  %s18_s23 = sadd.s32 1, %s567_s23   ;;  %s735_s18 = smov %s551_s19 }
 0x193   : > { %p15_p5 = scmp.ge.s32.totalorder %s18_s23, 4   ;;  %s736_s19 = smov %s555_s20 }
 0x194   : > { %s737_s20 = smov %s656_s6  ;;  %s738_s21 = smov %s563_s22 }
 0x195   : > { %s739_s22 = smov %s741_s26  ;;  %17 = sbr.rel (!%p15_p5) target bundleno = 4 (0x4), region = 75 }
 0x19c   :  { %354 = vsyncpa [#allocation3], 1 }
 0x19d   :  { %356 = vsyncpa [#allocation3 + $0x1], 1 }

</bundles_post_ra>
